<compile_context>
chip_gen: v7x
topology: tpu7x:2x2x1
jax: 0.10.0
libtpu: 0.0.40
codegen_flags: <defaults>
</compile_context>

<pallas_src>
import functools
import math

import jax
import jax.numpy as jnp
from jax import lax
from jax.experimental import pallas as pl
from jax.experimental.pallas import tpu as pltpu

_INV_SQRT2 = 1.0 / math.sqrt(2.0)
_SQRT_2_OVER_PI = math.sqrt(2.0 / math.pi)


def _gelu(x, approximate):
    if approximate:
        # tanh approximation: transcendental lands on the EUP slot (opt-in).
        return 0.5 * x * (1.0 + jnp.tanh(_SQRT_2_OVER_PI * (x + 0.044715 * x * x * x)))
    # PyTorch nn.GELU() default = exact erf-based GELU.
    return 0.5 * x * (1.0 + lax.erf(x * _INV_SQRT2))


def projection_kernel(x_ref, w1_ref, b1_ref, w2_ref, b2_ref, o_ref, h_ref, *,
                      approximate_gelu):
    # First Linear + GELU runs only once per row tile (column index j == 0);
    # the result is cached in a VMEM scratch (in the second matmul's operand
    # dtype) and reused for every w2 column tile.
    @pl.when(pl.program_id(1) == 0)
    def _():
        h = jnp.dot(x_ref[...], w1_ref[...], preferred_element_type=jnp.float32)
        h = h + b1_ref[...]                      # f32 bias, broadcast over rows
        h = _gelu(h, approximate_gelu)           # GELU on the f32 accumulator
        h_ref[...] = h.astype(h_ref.dtype)       # back to MXU operand dtype

    y = jnp.dot(h_ref[...], w2_ref[...], preferred_element_type=jnp.float32)
    o_ref[...] = (y + b2_ref[...]).astype(o_ref.dtype)


def _vmem_capacity_bytes():
    try:
        cap = getattr(pltpu.get_tpu_info(), "vmem_capacity_bytes", None)
        if cap:
            return int(cap)
    except Exception:
        pass
    return 64 << 20  # conservative fallback (v7x per-TensorCore VMEM)


def projection_forward(x, w1, b1, w2, b2, *, approximate_gelu=False):
    """x: [B, S, mm_hidden] -> [B, S, hidden].  w1:[mm_hidden,hidden], w2:[hidden,hidden]."""
    B, S, K = x.shape
    H = w1.shape[1]
    M = B * S

    x2d = x.reshape(M, K)                        # metadata-only reshape, no copy
    b1_2d = b1.astype(jnp.float32).reshape(1, H)
    b2_2d = b2.astype(jnp.float32).reshape(1, H)

    xbytes = x.dtype.itemsize
    wbytes = w1.dtype.itemsize

    cap = _vmem_capacity_bytes()
    budget = int(0.75 * cap)

    def plan_bytes(tm, tn):
        col_tiled = tn < H
        w2_bufs = 2 if col_tiled else 1           # double-buffer only if streamed
        r = K * H * wbytes + H * 4                # w1 + b1 (Buffered(1), resident)
        r += w2_bufs * (H * tn * wbytes + tn * 4)  # w2 + b2
        r += 2 * tm * K * xbytes                  # x row tile, double-buffered
        r += 2 * tm * tn * xbytes                 # out tile, double-buffered
        r += tm * H * wbytes                      # h scratch (cached GELU output)
        r += tm * max(H, tn) * 4                  # f32 compute temporaries headroom
        return r

    # Largest row tile first (amortizes the ~0.35 us grid-step overhead and the
    # x/out DMA), then fall back to column-tiling w2 if the weights don't fit.
    tm_cands = sorted({min(c, M) for c in (1024, 512, 256, 128, 64, 32, 16, 8)},
                      reverse=True)
    tn_cands = sorted({min(c, H) for c in (H, 8192, 4096, 2048, 1024, 512, 256, 128)},
                      reverse=True)

    tm, tn = tm_cands[-1], tn_cands[-1]
    found = False
    for tn_c in tn_cands:
        for tm_c in tm_cands:
            if plan_bytes(tm_c, tn_c) <= budget:
                tm, tn = tm_c, tn_c
                found = True
                break
        if found:
            break
    # TODO(synk): for very large mm_hidden (huge K) also tile K with a trailing
    # "arbitrary" axis + f32 VMEM accumulator; typical projector sizes fit as-is.

    col_tiled = tn < H
    n_row = pl.cdiv(M, tm)
    n_col = pl.cdiv(H, tn)

    resident = dict(pipeline_mode=pl.Buffered(1))   # single buffer for resident operands
    w2_kwargs = {} if col_tiled else resident       # double-buffer w2/b2 only when streamed

    plan = plan_bytes(tm, tn)
    vmem_limit = int(min(0.9 * cap, max(1.5 * plan, 16 << 20)))

    cost = pl.CostEstimate(
        flops=2 * M * (K * H + H * H),
        transcendentals=M * H,
        bytes_accessed=(M * K + M * H) * xbytes + (K * H + H * H) * wbytes + 2 * H * 4,
    )

    kernel = functools.partial(projection_kernel, approximate_gelu=approximate_gelu)

    out = pl.pallas_call(
        kernel,
        out_shape=jax.ShapeDtypeStruct((M, H), x.dtype),
        grid=(n_row, n_col),
        in_specs=[
            pl.BlockSpec((tm, K), lambda i, j: (i, 0)),                # streamed x rows
            pl.BlockSpec((K, H), lambda i, j: (0, 0), **resident),     # w1: VMEM-resident
            pl.BlockSpec((1, H), lambda i, j: (0, 0), **resident),     # b1: VMEM-resident
            pl.BlockSpec((H, tn), lambda i, j: (0, j), **w2_kwargs),   # w2: resident or col-tiled
            pl.BlockSpec((1, tn), lambda i, j: (0, j), **w2_kwargs),   # b2
        ],
        out_specs=pl.BlockSpec((tm, tn), lambda i, j: (i, j)),
        scratch_shapes=[pltpu.VMEM((tm, H), w2.dtype)],                # cached GELU(h)
        compiler_params=pltpu.CompilerParams(
            # Row tiles are independent -> "parallel" (megacore sharding);
            # the w2-column axis reuses the per-row h scratch -> "arbitrary".
            # TODO(synk): on v7x verify via the Mosaic dump that "parallel"
            # actually shards row tiles across the 2 TCs; else use pl.core_map.
            dimension_semantics=("parallel", "arbitrary"),
            vmem_limit_bytes=vmem_limit,
        ),
        cost_estimate=cost,
    )(x2d, w1, b1_2d, w2, b2_2d)

    return out.reshape(B, S, H)


def reference_forward(x, w1, b1, w2, b2, *, approximate_gelu=False):
    # Pure-JAX reference mirroring the kernel's dtype flow
    # (native-dtype matmuls, f32 accumulation, f32 bias + GELU, bf16 h).
    B, S, K = x.shape
    H = w1.shape[1]
    h = jnp.dot(x.reshape(-1, K), w1, preferred_element_type=jnp.float32)
    h = h + b1.astype(jnp.float32)
    h = _gelu(h, approximate_gelu)
    h = h.astype(w2.dtype)
    y = jnp.dot(h, w2, preferred_element_type=jnp.float32) + b2.astype(jnp.float32)
    return y.astype(x.dtype).reshape(B, S, H)


if __name__ == "__main__":
    # Small but lane-dense / MXU-friendly shapes (features multiple of 128).
    B, S = 2, 256
    mm_hidden_size, hidden_size = 256, 256
    dtype = jnp.bfloat16

    key = jax.random.PRNGKey(0)
    kx, kw1, kb1, kw2, kb2 = jax.random.split(key, 5)

    x = jax.random.normal(kx, (B, S, mm_hidden_size), jnp.float32).astype(dtype)

    # Deterministic synthetic parameters (PyTorch-Linear-like scale),
    # stored as [in, out] (transposed vs. torch's [out, in]).
    lim1 = 1.0 / math.sqrt(mm_hidden_size)
    lim2 = 1.0 / math.sqrt(hidden_size)
    w1 = jax.random.uniform(kw1, (mm_hidden_size, hidden_size), jnp.float32, -lim1, lim1).astype(dtype)
    b1 = jax.random.uniform(kb1, (hidden_size,), jnp.float32, -lim1, lim1)
    w2 = jax.random.uniform(kw2, (hidden_size, hidden_size), jnp.float32, -lim2, lim2).astype(dtype)
    b2 = jax.random.uniform(kb2, (hidden_size,), jnp.float32, -lim2, lim2)

    out = jax.block_until_ready(projection_forward(x, w1, b1, w2, b2))
    ref = reference_forward(x, w1, b1, w2, b2)

    assert out.shape == (B, S, hidden_size)
    err = float(jnp.max(jnp.abs(out.astype(jnp.float32) - ref.astype(jnp.float32))))
    assert err < 2e-2, f"mismatch vs reference, max abs err {err}"

    print("KERNEL_OK")
</pallas_src>

<mosaic_0001>
module attributes {stable_mosaic.version = 11 : i64} {
  func.func @projection_kernel(%arg0: i32, %arg1: i32, %arg2: memref<512x256xbf16, #tpu.memory_space<vmem>>, %arg3: memref<256x256xbf16, #tpu.memory_space<vmem>>, %arg4: memref<1x256xf32, #tpu.memory_space<vmem>>, %arg5: memref<256x256xbf16, #tpu.memory_space<vmem>>, %arg6: memref<1x256xf32, #tpu.memory_space<vmem>>, %arg7: memref<512x256xbf16, #tpu.memory_space<vmem>>, %arg8: memref<512x256xbf16, #tpu.memory_space<vmem>>) attributes {dimension_semantics = [#tpu.dimension_semantics<parallel>, #tpu.dimension_semantics<arbitrary>], iteration_bounds = array<i64: 1, 1>, scalar_prefetch = 0 : i64, scratch_operands = 1 : i64, tpu.core_type = #tpu.core_type<tc>, window_params = [{transform_indices = @transform_0, window_bounds = array<i64: 512, 256>}, {pipeline_mode = #tpu.pipeline_mode<synchronous>, transform_indices = @transform_1, window_bounds = array<i64: 256, 256>}, {pipeline_mode = #tpu.pipeline_mode<synchronous>, transform_indices = @transform_2, window_bounds = array<i64: 1, 256>}, {pipeline_mode = #tpu.pipeline_mode<synchronous>, transform_indices = @transform_3, window_bounds = array<i64: 256, 256>}, {pipeline_mode = #tpu.pipeline_mode<synchronous>, transform_indices = @transform_4, window_bounds = array<i64: 1, 256>}, {transform_indices = @transform_5, window_bounds = array<i64: 512, 256>}]} {
    %c0_i32 = arith.constant 0 : i32
    %0 = arith.cmpi eq, %arg1, %c0_i32 : i32
    %1 = arith.extui %0 : i1 to i32
    %c0_i32_0 = arith.constant 0 : i32
    %2 = arith.cmpi ne, %1, %c0_i32_0 : i32
    scf.if %2 {
      %c0_8 = arith.constant 0 : index
      %c0_9 = arith.constant 0 : index
      %11 = vector.load %arg2[%c0_8, %c0_9] : memref<512x256xbf16, #tpu.memory_space<vmem>>, vector<512x256xbf16>
      %c0_10 = arith.constant 0 : index
      %c0_11 = arith.constant 0 : index
      %12 = vector.load %arg3[%c0_10, %c0_11] : memref<256x256xbf16, #tpu.memory_space<vmem>>, vector<256x256xbf16>
      %cst_12 = arith.constant dense<0.000000e+00> : vector<512x256xf32>
      %13 = tpu.matmul %11, %12, %cst_12 {dimension_numbers = #tpu.dot_dimension_numbers<[1], [0], [0], [1], [0, 0, 1, 1], [], []>} : vector<512x256xbf16>, vector<256x256xbf16>, vector<512x256xf32> -> vector<512x256xf32>
      %c0_13 = arith.constant 0 : index
      %c0_14 = arith.constant 0 : index
      %14 = vector.load %arg4[%c0_13, %c0_14] : memref<1x256xf32, #tpu.memory_space<vmem>>, vector<1x256xf32>
      %15 = vector.broadcast %14 : vector<1x256xf32> to vector<512x256xf32>
      %16 = arith.addf %13, %15 : vector<512x256xf32>
      %cst_15 = arith.constant 5.000000e-01 : f32
      %17 = vector.broadcast %cst_15 : f32 to vector<512x256xf32>
      %18 = arith.mulf %17, %16 : vector<512x256xf32>
      %cst_16 = arith.constant 0.707106769 : f32
      %19 = vector.broadcast %cst_16 : f32 to vector<512x256xf32>
      %20 = arith.mulf %16, %19 : vector<512x256xf32>
      %21 = math.erf %20 : vector<512x256xf32>
      %cst_17 = arith.constant 1.000000e+00 : f32
      %22 = vector.broadcast %cst_17 : f32 to vector<512x256xf32>
      %23 = arith.addf %22, %21 : vector<512x256xf32>
      %24 = arith.mulf %18, %23 : vector<512x256xf32>
      %25 = arith.truncf %24 : vector<512x256xf32> to vector<512x256xbf16>
      %c0_18 = arith.constant 0 : index
      %c0_19 = arith.constant 0 : index
      %26 = vector.load %arg8[%c0_18, %c0_19] : memref<512x256xbf16, #tpu.memory_space<vmem>>, vector<512x256xbf16>
      tpu.vector_store %arg8[%c0_18, %c0_19], %25 {strides = array<i32>} : memref<512x256xbf16, #tpu.memory_space<vmem>>, vector<512x256xbf16>,
    } else {
    }
    %c0 = arith.constant 0 : index
    %c0_1 = arith.constant 0 : index
    %3 = vector.load %arg8[%c0, %c0_1] : memref<512x256xbf16, #tpu.memory_space<vmem>>, vector<512x256xbf16>
    %c0_2 = arith.constant 0 : index
    %c0_3 = arith.constant 0 : index
    %4 = vector.load %arg5[%c0_2, %c0_3] : memref<256x256xbf16, #tpu.memory_space<vmem>>, vector<256x256xbf16>
    %cst = arith.constant dense<0.000000e+00> : vector<512x256xf32>
    %5 = tpu.matmul %3, %4, %cst {dimension_numbers = #tpu.dot_dimension_numbers<[1], [0], [0], [1], [0, 0, 1, 1], [], []>} : vector<512x256xbf16>, vector<256x256xbf16>, vector<512x256xf32> -> vector<512x256xf32>
    %c0_4 = arith.constant 0 : index
    %c0_5 = arith.constant 0 : index
    %6 = vector.load %arg6[%c0_4, %c0_5] : memref<1x256xf32, #tpu.memory_space<vmem>>, vector<1x256xf32>
    %7 = vector.broadcast %6 : vector<1x256xf32> to vector<512x256xf32>
    %8 = arith.addf %5, %7 : vector<512x256xf32>
    %9 = arith.truncf %8 : vector<512x256xf32> to vector<512x256xbf16>
    %c0_6 = arith.constant 0 : index
    %c0_7 = arith.constant 0 : index
    %10 = vector.load %arg7[%c0_6, %c0_7] : memref<512x256xbf16, #tpu.memory_space<vmem>>, vector<512x256xbf16>
    tpu.vector_store %arg7[%c0_6, %c0_7], %9 {strides = array<i32>} : memref<512x256xbf16, #tpu.memory_space<vmem>>, vector<512x256xbf16>,
    return
  }
  func.func @transform_0(%arg0: i32, %arg1: i32) -> (i32, i32) {
    %c0_i32 = arith.constant 0 : i32
    %c0_i32_0 = arith.constant 0 : i32
    return %arg0, %c0_i32 : i32, i32
  }
  func.func @transform_1(%arg0: i32, %arg1: i32) -> (i32, i32) {
    %c0_i32 = arith.constant 0 : i32
    %c0_i32_0 = arith.constant 0 : i32
    %c0_i32_1 = arith.constant 0 : i32
    return %c0_i32, %c0_i32_0 : i32, i32
  }
  func.func @transform_2(%arg0: i32, %arg1: i32) -> (i32, i32) {
    %c0_i32 = arith.constant 0 : i32
    %c0_i32_0 = arith.constant 0 : i32
    %c0_i32_1 = arith.constant 0 : i32
    return %c0_i32, %c0_i32_0 : i32, i32
  }
  func.func @transform_3(%arg0: i32, %arg1: i32) -> (i32, i32) {
    %c0_i32 = arith.constant 0 : i32
    %c0_i32_0 = arith.constant 0 : i32
    return %c0_i32, %arg1 : i32, i32
  }
  func.func @transform_4(%arg0: i32, %arg1: i32) -> (i32, i32) {
    %c0_i32 = arith.constant 0 : i32
    %c0_i32_0 = arith.constant 0 : i32
    return %c0_i32, %arg1 : i32, i32
  }
  func.func @transform_5(%arg0: i32, %arg1: i32) -> (i32, i32) {
    %c0_i32 = arith.constant 0 : i32
    return %arg0, %arg1 : i32, i32
  }
}

</mosaic_0001>

<bundles_post_ra>
// kernel: tpu_custom_call.1
= control target key start
LH: loop header
LB: loop body
LE: loop exit
PB: predicated region body
PF: predicated region fallthrough
CT: control target
= control target key end

     0   :  { %10 = vsyncpa [#allocation4], 0  ;;  %s4539_s0 = inlined_call_operand.hbm [shape: bf16[512,256], index: 0, kind: input, shape index: {}]   ;;  %s4540_s1 = inlined_call_operand.hbm [shape: bf16[256,256], index: 1, kind: input, shape index: {}]   ;;  %s4541_s2 = inlined_call_operand.vmem [shape: f32[1,256], index: 2, kind: input, shape index: {}]   ;;  %s4542_s3 = inlined_call_operand.hbm [shape: bf16[256,256], index: 3, kind: input, shape index: {}]   ;;  %s4543_s4 = inlined_call_operand.vmem [shape: f32[1,256], index: 4, kind: input, shape index: {}]   ;;  %s4544_s5 = inlined_call_operand.hbm [shape: bf16[512,256], index: 5, kind: output, shape index: {}]  }
   0x1   :  { %11 = vsyncpa [#allocation7], 0 }
   0x2   :  { %12 = vsyncpa [#allocation5], 0  ;;  %s3666_s18 = smov [#allocation6]   ;;  %s3667_s20 = smov [#allocation3]  }
   0x3   :  { %s30_s19 = sshll.u32 %s3666_s18, 4  ;;  %s18_s21 = sshll.u32 %s3667_s20, 4  ;;  %s31_s19 = int_to_ptr.vmem [resolvable:$true] %s30_s19  ;;  %s3702_s21 = int_to_ptr.vmem [resolvable:$true] %s18_s21 }
   0x4   :  { %s3572_s24 = scalar_lea.hbm %s4540_s1, 4096 }
   0x5   :  { %p3573_p0 = scmp.ne.s32.totalorder %s4540_s1, %s3572_s24  ;;  %p3576_p1 = scmp.lt.u32.totalorder %s3572_s24, %s4540_s1 }
   0x7   :  { %p3578_p2 = pnand %p3576_p1, %p3573_p0 }
   0x9   :  { %3581 = shalt.err (!%p3578_p2)
}
   0xa   :  { %s3582_s29 = scalar_lea.vmem %s31_s19, 4096  ;;  %p3587_p4 = scmp.lt.s32.totalorder %s31_s19, %s31_s19 }
   0xb   :  { %p3583_p3 = scmp.ne.s32.totalorder %s31_s19, %s3582_s29  ;;  %p3588_p5 = scmp.lt.s32.totalorder %s3582_s29, %s3582_s29 }
   0xd   :  { %p3589_p6 = por %p3588_p5, %p3587_p4 }
   0xf   :  { %p3590_p7 = pnand %p3589_p6, %p3583_p3 }
  0x11   :  { %3593 = shalt.err (!%p3590_p7)
}
  0x12   :  { %s3668_s30 = smov 128   ;;  %s3669_s6 = smov 8  }
  0x13   :  { %36 = dma.hbm_to_vmem [thread:$0]  %s4540_s1, 4096, %s31_s19, [#allocation7], %s3668_s30, %s3668_s30, %s3669_s6  }
  0x14   :  { %s3594_s11 = scalar_lea.hbm %s4539_s0, 8192 }
  0x15   :  { %p3595_p8 = scmp.ne.s32.totalorder %s4539_s0, %s3594_s11  ;;  %p3598_p9 = scmp.lt.u32.totalorder %s3594_s11, %s4539_s0 }
  0x17   :  { %p3600_p10 = pnand %p3598_p9, %p3595_p8 }
  0x19   :  { %3603 = shalt.err (!%p3600_p10)
}
  0x1a   :  { %s3604_s16 = scalar_lea.vmem %s3702_s21, 8192  ;;  %p3609_p12 = scmp.lt.s32.totalorder %s3702_s21, %s3702_s21 }
  0x1b   :  { %p3605_p11 = scmp.ne.s32.totalorder %s3702_s21, %s3604_s16  ;;  %p3610_p13 = scmp.lt.s32.totalorder %s3604_s16, %s3604_s16 }
  0x1d   :  { %p3611_p0 = por %p3610_p13, %p3609_p12 }
  0x1f   :  { %p3612_p1 = pnand %p3611_p0, %p3605_p11 }
  0x21   :  { %3615 = shalt.err (!%p3612_p1)
}
  0x22   :  { %24 = dma.hbm_to_vmem [thread:$0]  %s4539_s0, 8192, %s3702_s21, [#allocation4], %s3668_s30, %s3668_s30, %s3669_s6  }
  0x23   :  { %s3670_s18 = smov [#allocation8]   ;;  %s3616_s23 = scalar_lea.hbm %s4542_s3, 4096 }
  0x24   :  { %s44_s19 = sshll.u32 %s3670_s18, 4  ;;  %p3617_p2 = scmp.ne.s32.totalorder %s4542_s3, %s3616_s23  ;;  %s45_s19 = int_to_ptr.vmem [resolvable:$true] %s44_s19 }
  0x25   :  { %p3620_p3 = scmp.lt.u32.totalorder %s3616_s23, %s4542_s3 }
  0x27   :  { %p3622_p4 = pnand %p3620_p3, %p3617_p2 }
  0x29   :  { %3625 = shalt.err (!%p3622_p4)
}
  0x2a   :  { %s3626_s28 = scalar_lea.vmem %s45_s19, 4096  ;;  %p3631_p6 = scmp.lt.s32.totalorder %s45_s19, %s45_s19 }
  0x2b   :  { %p3627_p5 = scmp.ne.s32.totalorder %s45_s19, %s3626_s28  ;;  %p3632_p7 = scmp.lt.s32.totalorder %s3626_s28, %s3626_s28 }
  0x2d   :  { %p3633_p8 = por %p3632_p7, %p3631_p6 }
  0x2f   :  { %p3634_p9 = pnand %p3633_p8, %p3627_p5 }
  0x31   :  { %3637 = shalt.err (!%p3634_p9)
}
  0x32   :  { %50 = dma.hbm_to_vmem [thread:$0]  %s4542_s3, 4096, %s45_s19, [#allocation7], %s3668_s30, %s3668_s30, %s3669_s6  }
  0x33   :  { %3660 = dma.done.wait [#allocation4], 8192  }
  0x34   :  { %3661 = vsyncadd [#allocation4], 4294959104 }
  0x35   :  { %3662 = dma.done.wait [#allocation7], 8192  }
  0x36   :  { %3663 = vsyncadd [#allocation7], 4294959104  ;;  %v3124_v0 = vld [vmem:[#allocation6 + $0x4] ss:$8 sps:$4 sm:$0xff]   ;;  %v3126_v1 = vld [vmem:[#allocation6] ss:$8 sps:$4 sm:$0xff]  }
  0x37   :  { %654 = vmatprep.subr.bf16.mxu0 %v3124_v0  ;;  %v3127_v2 = vld [vmem:[#allocation6 + $0x14] ss:$8 sps:$4 sm:$0xff]   ;;  %v3129_v3 = vld [vmem:[#allocation6 + $0x10] ss:$8 sps:$4 sm:$0xff]   ;;  %v3130_v4 = vld [vmem:[#allocation6 + $0x24] ss:$8 sps:$4 sm:$0xff]  }
  0x38   :  { %655 = vmatpush1.bf16.msra.mxu0 %v3126_v1  ;;  %v3132_v5 = vld [vmem:[#allocation6 + $0x20] ss:$8 sps:$4 sm:$0xff]   ;;  %v3133_v6 = vld [vmem:[#allocation6 + $0x34] ss:$8 sps:$4 sm:$0xff]   ;;  %v3135_v7 = vld [vmem:[#allocation6 + $0x30] ss:$8 sps:$4 sm:$0xff]  }
  0x39   :  { %656 = vmatprep.subr.bf16.mxu0 %v3127_v2  ;;  %v3136_v8 = vld [vmem:[#allocation6 + $0x44] ss:$8 sps:$4 sm:$0xff]   ;;  %v3138_v9 = vld [vmem:[#allocation6 + $0x40] ss:$8 sps:$4 sm:$0xff]   ;;  %v3139_v10 = vld [vmem:[#allocation6 + $0x54] ss:$8 sps:$4 sm:$0xff]  }
  0x3a   :  { %v3141_v11 = vld [vmem:[#allocation6 + $0x50] ss:$8 sps:$4 sm:$0xff]   ;;  %v3142_v12 = vld [vmem:[#allocation6 + $0x64] ss:$8 sps:$4 sm:$0xff]   ;;  %v3144_v14 = vld [vmem:[#allocation6 + $0x60] ss:$8 sps:$4 sm:$0xff]  }
  0x3b   :  { %v3174_v13 = vld [vmem:[#allocation3 + $0x4] ss:$8 sps:$4 sm:$0xff]   ;;  %v3145_v15 = vld [vmem:[#allocation6 + $0x74] ss:$8 sps:$4 sm:$0xff]   ;;  %v3147_v16 = vld [vmem:[#allocation6 + $0x70] ss:$8 sps:$4 sm:$0xff]  }
  0x3c   :  { %657 = vmatpush1.bf16.msra.mxu0 %v3129_v3  ;;  %686 = vmatprep.mubr.bf16.mxu0 %v3174_v13  ;;  %v3148_v17 = vld [vmem:[#allocation6 + $0x84] ss:$8 sps:$4 sm:$0xff]   ;;  %v3150_v18 = vld [vmem:[#allocation6 + $0x80] ss:$8 sps:$4 sm:$0xff]   ;;  %v3151_v19 = vld [vmem:[#allocation6 + $0x94] ss:$8 sps:$4 sm:$0xff]  }
  0x3d   :  { %658 = vmatprep.subr.bf16.mxu0 %v3130_v4  ;;  %v3153_v20 = vld [vmem:[#allocation6 + $0x90] ss:$8 sps:$4 sm:$0xff]   ;;  %v3154_v21 = vld [vmem:[#allocation6 + $0xa4] ss:$8 sps:$4 sm:$0xff]   ;;  %v3156_v22 = vld [vmem:[#allocation6 + $0xa0] ss:$8 sps:$4 sm:$0xff]  }
  0x3e   :  { %v3157_v23 = vld [vmem:[#allocation6 + $0xb4] ss:$8 sps:$4 sm:$0xff]   ;;  %v3159_v24 = vld [vmem:[#allocation6 + $0xb0] ss:$8 sps:$4 sm:$0xff]   ;;  %v3160_v25 = vld [vmem:[#allocation6 + $0xc4] ss:$8 sps:$4 sm:$0xff]  }
  0x3f   :  { %v3162_v26 = vld [vmem:[#allocation6 + $0xc0] ss:$8 sps:$4 sm:$0xff]   ;;  %v3163_v27 = vld [vmem:[#allocation6 + $0xd4] ss:$8 sps:$4 sm:$0xff]   ;;  %v3165_v28 = vld [vmem:[#allocation6 + $0xd0] ss:$8 sps:$4 sm:$0xff]  }
  0x40   :  { %659 = vmatpush1.bf16.msra.mxu0 %v3132_v5  ;;  %v3166_v29 = vld [vmem:[#allocation6 + $0xe4] ss:$8 sps:$4 sm:$0xff]   ;;  %v3168_v30 = vld [vmem:[#allocation6 + $0xe0] ss:$8 sps:$4 sm:$0xff]   ;;  %v3169_v31 = vld [vmem:[#allocation6 + $0xf4] ss:$8 sps:$4 sm:$0xff]  }
  0x41   :  { %660 = vmatprep.subr.bf16.mxu0 %v3133_v6  ;;  %v3171_v32 = vld [vmem:[#allocation6 + $0xf0] ss:$8 sps:$4 sm:$0xff]   ;;  %v3172_v33 = vld [vmem:[#allocation3] ss:$8 sps:$4 sm:$0xff]   ;;  %v3175_v34 = vld [vmem:[#allocation3 + $0x14] ss:$8 sps:$4 sm:$0xff]  }
  0x42   :  { %v3177_v35 = vld [vmem:[#allocation3 + $0x10] ss:$8 sps:$4 sm:$0xff]   ;;  %v3178_v36 = vld [vmem:[#allocation3 + $0x24] ss:$8 sps:$4 sm:$0xff]   ;;  %v3180_v37 = vld [vmem:[#allocation3 + $0x20] ss:$8 sps:$4 sm:$0xff]  }
  0x43   :  { %v3181_v38 = vld [vmem:[#allocation3 + $0x34] ss:$8 sps:$4 sm:$0xff]   ;;  %v3183_v39 = vld [vmem:[#allocation3 + $0x30] ss:$8 sps:$4 sm:$0xff]   ;;  %v3184_v40 = vld [vmem:[#allocation3 + $0x44] ss:$8 sps:$4 sm:$0xff]  }
  0x44   :  { %661 = vmatpush1.bf16.msra.mxu0 %v3135_v7  ;;  %v3186_v41 = vld [vmem:[#allocation3 + $0x40] ss:$8 sps:$4 sm:$0xff]   ;;  %v3187_v42 = vld [vmem:[#allocation3 + $0x54] ss:$8 sps:$4 sm:$0xff]   ;;  %v3189_v43 = vld [vmem:[#allocation3 + $0x50] ss:$8 sps:$4 sm:$0xff]  }
  0x45   :  { %662 = vmatprep.subr.bf16.mxu0 %v3136_v8  ;;  %v3190_v44 = vld [vmem:[#allocation3 + $0x64] ss:$8 sps:$4 sm:$0xff]   ;;  %v3240_v46 = vld [vmem:[#allocation8] ss:$8 sps:$4 sm:$0xff]   ;;  %v3193_v48 = vld [vmem:[#allocation3 + $0x74] ss:$8 sps:$4 sm:$0xff]  }
  0x46   :  { %v3238_v45 = vld [vmem:[#allocation8 + $0x4] ss:$8 sps:$4 sm:$0xff]   ;;  %v3192_v47 = vld [vmem:[#allocation3 + $0x60] ss:$8 sps:$4 sm:$0xff]   ;;  %v3244_v49 = vld [vmem:[#allocation8 + $0x14] ss:$8 sps:$4 sm:$0xff]  }
  0x47   :  { %2043 = vmatprep.subr.bf16.mxu1 %v3238_v45  ;;  %v3246_v50 = vld [vmem:[#allocation8 + $0x10] ss:$8 sps:$4 sm:$0xff]   ;;  %v3247_v51 = vld [vmem:[#allocation8 + $0x24] ss:$8 sps:$4 sm:$0xff]   ;;  %v3249_v52 = vld [vmem:[#allocation8 + $0x20] ss:$8 sps:$4 sm:$0xff]  }
  0x48   :  { %663 = vmatpush1.bf16.msra.mxu0 %v3138_v9  ;;  %2044 = vmatpush1.bf16.msra.mxu1 %v3240_v46  ;;  %v3195_v53 = vld [vmem:[#allocation3 + $0x70] ss:$8 sps:$4 sm:$0xff]   ;;  %v3196_v54 = vld [vmem:[#allocation3 + $0x84] ss:$8 sps:$4 sm:$0xff]   ;;  %v3253_v55 = vld [vmem:[#allocation8 + $0x34] ss:$8 sps:$4 sm:$0xff]  }
  0x49   :  { %664 = vmatprep.subr.bf16.mxu0 %v3139_v10  ;;  %2045 = vmatprep.subr.bf16.mxu1 %v3244_v49  ;;  %v3255_v56 = vld [vmem:[#allocation8 + $0x30] ss:$8 sps:$4 sm:$0xff]   ;;  %v3256_v57 = vld [vmem:[#allocation8 + $0x44] ss:$8 sps:$4 sm:$0xff]   ;;  %v3258_v58 = vld [vmem:[#allocation8 + $0x40] ss:$8 sps:$4 sm:$0xff]  }
  0x4a   :  { %v3198_v59 = vld [vmem:[#allocation3 + $0x80] ss:$8 sps:$4 sm:$0xff]   ;;  %v3199_v60 = vld [vmem:[#allocation3 + $0x94] ss:$8 sps:$4 sm:$0xff]   ;;  %v3264_v62 = vld [vmem:[#allocation8 + $0x50] ss:$8 sps:$4 sm:$0xff]  }
  0x4b   :  { %v3262_v61 = vld [vmem:[#allocation8 + $0x54] ss:$8 sps:$4 sm:$0xff]   ;;  %v3265_v63 = vld [vmem:[#allocation8 + $0x64] ss:$8 sps:$4 sm:$0xff]   ;;  %v3267_v0 = vld [vmem:[#allocation8 + $0x60] ss:$8 sps:$4 sm:$0xff]  }
  0x4c   :  { %665 = vmatpush1.bf16.msra.mxu0 %v3141_v11  ;;  %2046 = vmatpush1.bf16.msra.mxu1 %v3246_v50  ;;  %v3201_v1 = vld [vmem:[#allocation3 + $0x90] ss:$8 sps:$4 sm:$0xff]   ;;  %v3202_v2 = vld [vmem:[#allocation3 + $0xa4] ss:$8 sps:$4 sm:$0xff]   ;;  %v3271_v3 = vld [vmem:[#allocation8 + $0x74] ss:$8 sps:$4 sm:$0xff]  }
  0x4d   :  { %666 = vmatprep.subr.bf16.mxu0 %v3142_v12  ;;  %2047 = vmatprep.subr.bf16.mxu1 %v3247_v51  ;;  %v3273_v4 = vld [vmem:[#allocation8 + $0x70] ss:$8 sps:$4 sm:$0xff]   ;;  %v3274_v5 = vld [vmem:[#allocation8 + $0x84] ss:$8 sps:$4 sm:$0xff]   ;;  %v3276_v6 = vld [vmem:[#allocation8 + $0x80] ss:$8 sps:$4 sm:$0xff]  }
  0x4e   :  { %v3204_v7 = vld [vmem:[#allocation3 + $0xa0] ss:$8 sps:$4 sm:$0xff]   ;;  %v3205_v8 = vld [vmem:[#allocation3 + $0xb4] ss:$8 sps:$4 sm:$0xff]   ;;  %v3282_v10 = vld [vmem:[#allocation8 + $0x90] ss:$8 sps:$4 sm:$0xff]  }
  0x4f   :  { %v3280_v9 = vld [vmem:[#allocation8 + $0x94] ss:$8 sps:$4 sm:$0xff]   ;;  %v3283_v11 = vld [vmem:[#allocation8 + $0xa4] ss:$8 sps:$4 sm:$0xff]   ;;  %v3207_v12 = vld [vmem:[#allocation3 + $0xb0] ss:$8 sps:$4 sm:$0xff]  }
  0x50   :  { %667 = vmatpush1.bf16.msra.mxu0 %v3144_v14  ;;  %2048 = vmatpush1.bf16.msra.mxu1 %v3249_v52  ;;  %v3285_v13 = vld [vmem:[#allocation8 + $0xa0] ss:$8 sps:$4 sm:$0xff]   ;;  %v3208_v14 = vld [vmem:[#allocation3 + $0xc4] ss:$8 sps:$4 sm:$0xff]   ;;  %v3250_v46 = vld [vmem:[#allocation3 + $0x174] ss:$8 sps:$4 sm:$0xff]   ;;  %v164_v52 = vlaneseq }
  0x51   :  { %668 = vmatprep.subr.bf16.mxu0 %v3145_v15  ;;  %2049 = vmatprep.subr.bf16.mxu1 %v3253_v55  ;;  %v3289_v15 = vld [vmem:[#allocation8 + $0xb4] ss:$8 sps:$4 sm:$0xff]   ;;  %v3243_v45 = vld [vmem:[#allocation3 + $0x160] ss:$8 sps:$4 sm:$0xff]   ;;  %v3270_v51 = vld [vmem:[#allocation3 + $0x190] ss:$8 sps:$4 sm:$0xff]  }
  0x52   :  { %v3261_v49 = vld [vmem:[#allocation3 + $0x180] ss:$8 sps:$4 sm:$0xff]   ;;  %v3268_v50 = vld [vmem:[#allocation3 + $0x194] ss:$8 sps:$4 sm:$0xff]  }
  0x53   :  { %v3279_v55 = vld [vmem:[#allocation3 + $0x1a0] ss:$8 sps:$4 sm:$0xff]  }
  0x54   :  { %669 = vmatpush1.bf16.msra.mxu0 %v3147_v16  ;;  %2050 = vmatpush1.bf16.msra.mxu1 %v3255_v56  ;;  %v3291_v16 = vld [vmem:[#allocation8 + $0xb0] ss:$8 sps:$4 sm:$0xff]  }
  0x55   :  { %670 = vmatprep.subr.bf16.mxu0 %v3148_v17  ;;  %2051 = vmatprep.subr.bf16.mxu1 %v3256_v57  ;;  %v3292_v17 = vld [vmem:[#allocation8 + $0xc4] ss:$8 sps:$4 sm:$0xff]   ;;  %v162_v57 = vld [vmem:[%s4541_s2] sm:$0x3] }
  0x58   :  { %671 = vmatpush1.bf16.msra.mxu0 %v3150_v18  ;;  %2052 = vmatpush1.bf16.msra.mxu1 %v3258_v58  ;;  %v3210_v18 = vld [vmem:[#allocation3 + $0xc0] ss:$8 sps:$4 sm:$0xff]  }
  0x59   :  { %672 = vmatprep.subr.bf16.mxu0 %v3151_v19  ;;  %2053 = vmatprep.subr.bf16.mxu1 %v3262_v61  ;;  %v3294_v19 = vld [vmem:[#allocation8 + $0xc0] ss:$8 sps:$4 sm:$0xff]  }
  0x5c   :  { %673 = vmatpush1.bf16.msra.mxu0 %v3153_v20  ;;  %2054 = vmatpush1.bf16.msra.mxu1 %v3264_v62  ;;  %v3211_v20 = vld [vmem:[#allocation3 + $0xd4] ss:$8 sps:$4 sm:$0xff]  }
  0x5d   :  { %674 = vmatprep.subr.bf16.mxu0 %v3154_v21  ;;  %2055 = vmatprep.subr.bf16.mxu1 %v3265_v63  ;;  %v3298_v21 = vld [vmem:[#allocation8 + $0xd4] ss:$8 sps:$4 sm:$0xff]  }
  0x60   :  { %675 = vmatpush1.bf16.msra.mxu0 %v3156_v22  ;;  %2056 = vmatpush1.bf16.msra.mxu1 %v3267_v0  ;;  %v3300_v22 = vld [vmem:[#allocation8 + $0xd0] ss:$8 sps:$4 sm:$0xff]  }
  0x61   :  { %676 = vmatprep.subr.bf16.mxu0 %v3157_v23  ;;  %2057 = vmatprep.subr.bf16.mxu1 %v3271_v3  ;;  %v3301_v23 = vld [vmem:[#allocation8 + $0xe4] ss:$8 sps:$4 sm:$0xff]  }
  0x64   :  { %677 = vmatpush1.bf16.msra.mxu0 %v3159_v24  ;;  %2058 = vmatpush1.bf16.msra.mxu1 %v3273_v4  ;;  %v3213_v24 = vld [vmem:[#allocation3 + $0xd0] ss:$8 sps:$4 sm:$0xff]   ;;  %v3295_v4 = vld [vmem:[#allocation3 + $0x1c4] ss:$8 sps:$4 sm:$0xff]  }
  0x65   :  { %678 = vmatprep.subr.bf16.mxu0 %v3160_v25  ;;  %2059 = vmatprep.subr.bf16.mxu1 %v3274_v5  ;;  %v3303_v25 = vld [vmem:[#allocation8 + $0xe0] ss:$8 sps:$4 sm:$0xff]  }
  0x68   :  { %679 = vmatpush1.bf16.msra.mxu0 %v3162_v26  ;;  %2060 = vmatpush1.bf16.msra.mxu1 %v3276_v6  ;;  %v3214_v26 = vld [vmem:[#allocation3 + $0xe4] ss:$8 sps:$4 sm:$0xff]  }
  0x69   :  { %680 = vmatprep.subr.bf16.mxu0 %v3163_v27  ;;  %2061 = vmatprep.subr.bf16.mxu1 %v3280_v9  ;;  %v3307_v27 = vld [vmem:[#allocation8 + $0xf4] ss:$8 sps:$4 sm:$0xff]  }
  0x6c   :  { %681 = vmatpush1.bf16.msra.mxu0 %v3165_v28  ;;  %2062 = vmatpush1.bf16.msra.mxu1 %v3282_v10  ;;  %v3309_v28 = vld [vmem:[#allocation8 + $0xf0] ss:$8 sps:$4 sm:$0xff]  }
  0x6d   :  { %682 = vmatprep.subr.bf16.mxu0 %v3166_v29  ;;  %2063 = vmatprep.subr.bf16.mxu1 %v3283_v11  ;;  %v3216_v29 = vld [vmem:[#allocation3 + $0xe0] ss:$8 sps:$4 sm:$0xff]  }
  0x70   :  { %683 = vmatpush1.bf16.msra.mxu0 %v3168_v30  ;;  %2064 = vmatpush1.bf16.msra.mxu1 %v3285_v13  ;;  %v3217_v30 = vld [vmem:[#allocation3 + $0xf4] ss:$8 sps:$4 sm:$0xff]  }
  0x71   :  { %684 = vmatprep.subr.bf16.mxu0 %v3169_v31  ;;  %2065 = vmatprep.subr.bf16.mxu1 %v3289_v15  ;;  %v3219_v31 = vld [vmem:[#allocation3 + $0xf0] ss:$8 sps:$4 sm:$0xff]   ;;  %v3297_v15 = vld [vmem:[#allocation3 + $0x1c0] ss:$8 sps:$4 sm:$0xff]  }
  0x74   :  { %685 = vmatpush1.bf16.msra.mxu0 %v3171_v32  ;;  %2066 = vmatpush1.bf16.msra.mxu1 %v3291_v16  ;;  %v3220_v32 = vld [vmem:[#allocation3 + $0x104] ss:$8 sps:$4 sm:$0xff]  }
  0x75   :  { %2067 = vmatprep.subr.bf16.mxu1 %v3292_v17 }
  0x77   :  { %687 = vmatmul.mubr.bf16.vlgmr.msra.gmra.mrb[0].mxu0 %v3172_v33  ;;  %v3222_v33 = vld [vmem:[#allocation3 + $0x100] ss:$8 sps:$4 sm:$0xff]  }
  0x78   :  { %696 = vmatprep.mubr.bf16.mxu0 %v3175_v34  ;;  %2068 = vmatpush1.bf16.msra.mxu1 %v3294_v19  ;;  %v3223_v34 = vld [vmem:[#allocation3 + $0x114] ss:$8 sps:$4 sm:$0xff]  }
  0x79   :  { %2069 = vmatprep.subr.bf16.mxu1 %v3298_v21 }
  0x7c   :  { %2070 = vmatpush1.bf16.msra.mxu1 %v3300_v22 }
  0x7d   :  { %2071 = vmatprep.subr.bf16.mxu1 %v3301_v23 }
  0x7f   :  { %697 = vmatmul.mubr.bf16.gmra.mrb[4].mxu0 %v3177_v35  ;;  %v3225_v35 = vld [vmem:[#allocation3 + $0x110] ss:$8 sps:$4 sm:$0xff]  }
  0x80   :  { %706 = vmatprep.mubr.bf16.mxu0 %v3178_v36  ;;  %2072 = vmatpush1.bf16.msra.mxu1 %v3303_v25  ;;  %v3226_v36 = vld [vmem:[#allocation3 + $0x124] ss:$8 sps:$4 sm:$0xff]  }
  0x81   :  { %2073 = vmatprep.subr.bf16.mxu1 %v3307_v27 }
  0x84   :  { %2074 = vmatpush1.bf16.msra.mxu1 %v3309_v28 }
  0x87   :  { %707 = vmatmul.mubr.bf16.gmra.mrb[8].mxu0 %v3180_v37  ;;  %v3228_v37 = vld [vmem:[#allocation3 + $0x120] ss:$8 sps:$4 sm:$0xff]  }
  0x88   :  { %716 = vmatprep.mubr.bf16.mxu0 %v3181_v38  ;;  %v3229_v38 = vld [vmem:[#allocation3 + $0x134] ss:$8 sps:$4 sm:$0xff]  }
  0x8f   :  { %717 = vmatmul.mubr.bf16.gmra.mrb[12].mxu0 %v3183_v39  ;;  %v3231_v39 = vld [vmem:[#allocation3 + $0x130] ss:$8 sps:$4 sm:$0xff]  }
  0x90   :  { %726 = vmatprep.mubr.bf16.mxu0 %v3184_v40  ;;  %v3232_v40 = vld [vmem:[#allocation3 + $0x144] ss:$8 sps:$4 sm:$0xff]  }
  0x97   :  { %727 = vmatmul.mubr.bf16.gmra.mrb[16].mxu0 %v3186_v41  ;;  %v3234_v41 = vld [vmem:[#allocation3 + $0x140] ss:$8 sps:$4 sm:$0xff]  }
  0x98   :  { %736 = vmatprep.mubr.bf16.mxu0 %v3187_v42  ;;  %v3235_v42 = vld [vmem:[#allocation3 + $0x154] ss:$8 sps:$4 sm:$0xff]  }
  0x9f   :  { %737 = vmatmul.mubr.bf16.gmra.mrb[20].mxu0 %v3189_v43  ;;  %v3237_v43 = vld [vmem:[#allocation3 + $0x150] ss:$8 sps:$4 sm:$0xff]  }
  0xa0   :  { %746 = vmatprep.mubr.bf16.mxu0 %v3190_v44  ;;  %v3241_v44 = vld [vmem:[#allocation3 + $0x164] ss:$8 sps:$4 sm:$0xff]  }
  0xa7   :  { %747 = vmatmul.mubr.bf16.gmra.mrb[24].mxu0 %v3192_v47  ;;  %v3252_v47 = vld [vmem:[#allocation3 + $0x170] ss:$8 sps:$4 sm:$0xff]  }
  0xa8   :  { %756 = vmatprep.mubr.bf16.mxu0 %v3193_v48  ;;  %v3259_v48 = vld [vmem:[#allocation3 + $0x184] ss:$8 sps:$4 sm:$0xff]  }
  0xaf   :  { %757 = vmatmul.mubr.bf16.gmra.mrb[28].mxu0 %v3195_v53  ;;  %v3277_v53 = vld [vmem:[#allocation3 + $0x1a4] ss:$8 sps:$4 sm:$0xff]  }
  0xb0   :  { %766 = vmatprep.mubr.bf16.mxu0 %v3196_v54  ;;  %v3754_v54 = vshrl.u32 %v164_v52, 7 }
  0xb2   :  { %v166_v56 = vsub.s32 0, %v3754_v54  ;;  %v170_v58 = vsub.s32 1, %v3754_v54 }
  0xb4   :  { %v3767_v61 = vrot.slane %v162_v57, %v170_v58 }
  0xb7   :  { %767 = vmatmul.mubr.bf16.gmra.mrb[32].mxu0 %v3198_v59  ;;  %v3286_v59 = vld [vmem:[#allocation3 + $0x1b4] ss:$8 sps:$4 sm:$0xff]  }
  0xb8   :  { %776 = vmatprep.mubr.bf16.mxu0 %v3199_v60  ;;  %v3763_v60 = vrot.slane %v162_v57, %v166_v56 }
  0xbf   :  { %777 = vmatmul.mubr.bf16.gmra.mrb[36].mxu0 %v3201_v1  ;;  %v3288_v1 = vld [vmem:[#allocation3 + $0x1b0] ss:$8 sps:$4 sm:$0xff]  }
  0xc0   :  { %786 = vmatprep.mubr.bf16.mxu0 %v3202_v2 }
  0xc7   :  { %787 = vmatmul.mubr.bf16.gmra.mrb[40].mxu0 %v3204_v7 }
  0xc8   :  { %796 = vmatprep.mubr.bf16.mxu0 %v3205_v8 }
  0xcf   :  { %797 = vmatmul.mubr.bf16.gmra.mrb[44].mxu0 %v3207_v12 }
  0xd0   :  { %806 = vmatprep.mubr.bf16.mxu0 %v3208_v14 }
  0xd7   :  { %807 = vmatmul.mubr.bf16.gmra.mrb[48].mxu0 %v3210_v18  ;;  %v3304_v18 = vld [vmem:[#allocation3 + $0x1d4] ss:$8 sps:$4 sm:$0xff]  }
  0xd8   :  { %816 = vmatprep.mubr.bf16.mxu0 %v3211_v20 }
  0xdf   :  { %817 = vmatmul.mubr.bf16.gmra.mrb[52].mxu0 %v3213_v24 }
  0xe0   :  { %826 = vmatprep.mubr.bf16.mxu0 %v3214_v26 }
  0xe7   :  { %827 = vmatmul.mubr.bf16.gmra.mrb[56].mxu0 %v3216_v29 }
  0xe8   :  { %836 = vmatprep.mubr.bf16.mxu0 %v3217_v30 }
  0xef   :  { %837 = vmatmul.mubr.bf16.gmra.mrb[60].mxu0 %v3219_v31 }
  0xf0   :  { %846 = vmatprep.mubr.bf16.mxu0 %v3220_v32 }
  0xf7   :  { %847 = vmatmul.mubr.bf16.gmra.mrb[64].mxu0 %v3222_v33 }
  0xf8   :  { %856 = vmatprep.mubr.bf16.mxu0 %v3223_v34  ;;  %v3306_v34 = vld [vmem:[#allocation3 + $0x1d0] ss:$8 sps:$4 sm:$0xff]  }
  0xff   :  { %857 = vmatmul.mubr.bf16.gmra.mrb[68].mxu0 %v3225_v35 }
 0x100   :  { %866 = vmatprep.mubr.bf16.mxu0 %v3226_v36 }
 0x107   :  { %867 = vmatmul.mubr.bf16.gmra.mrb[72].mxu0 %v3228_v37 }
 0x108   :  { %876 = vmatprep.mubr.bf16.mxu0 %v3229_v38 }
 0x10f   :  { %877 = vmatmul.mubr.bf16.gmra.mrb[76].mxu0 %v3231_v39 }
 0x110   :  { %886 = vmatprep.mubr.bf16.mxu0 %v3232_v40 }
 0x117   :  { %887 = vmatmul.mubr.bf16.gmra.mrb[80].mxu0 %v3234_v41  ;;  %v3310_v41 = vld [vmem:[#allocation3 + $0x1e4] ss:$8 sps:$4 sm:$0xff]  }
 0x118   :  { %896 = vmatprep.mubr.bf16.mxu0 %v3235_v42 }
 0x11f   :  { %897 = vmatmul.mubr.bf16.gmra.mrb[84].mxu0 %v3237_v43 }
 0x120   :  { %906 = vmatprep.mubr.bf16.mxu0 %v3241_v44 }
 0x127   :  { %907 = vmatmul.mubr.bf16.gmra.mrb[88].mxu0 %v3243_v45 }
 0x128   :  { %916 = vmatprep.mubr.bf16.mxu0 %v3250_v46 }
 0x12f   :  { %917 = vmatmul.mubr.bf16.gmra.mrb[92].mxu0 %v3252_v47 }
 0x130   :  { %926 = vmatprep.mubr.bf16.mxu0 %v3259_v48 }
 0x137   :  { %927 = vmatmul.mubr.bf16.gmra.mrb[96].mxu0 %v3261_v49 }
 0x138   :  { %936 = vmatprep.mubr.bf16.mxu0 %v3268_v50 }
 0x13f   :  { %937 = vmatmul.mubr.bf16.gmra.mrb[100].mxu0 %v3270_v51 }
 0x140   :  { %946 = vmatprep.mubr.bf16.mxu0 %v3277_v53 }
 0x147   :  { %947 = vmatmul.mubr.bf16.gmra.mrb[104].mxu0 %v3279_v55 }
 0x148   :  { %956 = vmatprep.mubr.bf16.mxu0 %v3286_v59 }
 0x14a   :  { %v688_v62 = vpop.f32.mrb[0].mxu0 }
 0x14b   :  { %v689_v63 = vadd.f32 %v688_v62, %v3763_v60  ;;  %v690_v0 = vpop.f32.mrb[1].mxu0 }
 0x14c   :  { %v691_v2 = vadd.f32 %v690_v0, %v3767_v61  ;;  %v692_v3 = vpop.f32.mrb[2].mxu0 }
 0x14d   :  { %v1135_v5 = vmul.f32 0.70710677, %v689_v63  ;;  %v693_v6 = vadd.f32 %v692_v3, %v3763_v60  ;;  %v694_v7 = vpop.f32.mrb[3].mxu0  ;;  %v1007_v30 = vmul.f32 0.5, %v689_v63 }
 0x14e   :  { %v1136_v8 = vmul.f32 0.70710677, %v691_v2  ;;  %v695_v9 = vadd.f32 %v694_v7, %v3767_v61  ;;  %v1008_v42 = vmul.f32 0.5, %v691_v2  ;;  %v3312_v7 = vld [vmem:[#allocation3 + $0x1e0] ss:$8 sps:$4 sm:$0xff]  }
 0x14f   :  { %3316 = verf.f32 %v1135_v5  ;;  %v1137_v10 = vmul.f32 0.70710677, %v693_v6  ;;  %957 = vmatmul.mubr.bf16.gmra.mrb[108].mxu0 %v3288_v1  ;;  %v1009_v36 = vmul.f32 0.5, %v693_v6 }
 0x150   :  { %3318 = verf.f32 %v1136_v8  ;;  %v1138_v11 = vmul.f32 0.70710677, %v695_v9  ;;  %966 = vmatprep.mubr.bf16.mxu0 %v3295_v4  ;;  %v1010_v48 = vmul.f32 0.5, %v695_v9 }
 0x151   :  { %3320 = verf.f32 %v1137_v10 }
 0x152   :  { %3322 = verf.f32 %v1138_v11  ;;  %v698_v12 = vpop.f32.mrb[4].mxu0 }
 0x153   :  { %v3774_v13 = vadd.f32 %v698_v12, %v3763_v60  ;;  %v700_v14 = vpop.f32.mrb[5].mxu0 }
 0x154   :  { %v3777_v16 = vadd.f32 %v700_v14, %v3767_v61  ;;  %v702_v17 = vpop.f32.mrb[6].mxu0 }
 0x155   :  { %v1139_v19 = vmul.f32 0.70710677, %v3774_v13  ;;  %v703_v20 = vadd.f32 %v702_v17, %v3763_v60  ;;  %v704_v21 = vpop.f32.mrb[7].mxu0  ;;  %v1011_v9 = vmul.f32 0.5, %v3774_v13 }
 0x156   :  { %v1140_v22 = vmul.f32 0.70710677, %v3777_v16  ;;  %v3783_v23 = vadd.f32 %v704_v21, %v3767_v61  ;;  %v1012_v17 = vmul.f32 0.5, %v3777_v16 }
 0x157   :  { %3324 = verf.f32 %v1139_v19  ;;  %v1141_v24 = vmul.f32 0.70710677, %v703_v20  ;;  %967 = vmatmul.mubr.bf16.gmra.mrb[112].mxu0 %v3297_v15  ;;  %v1013_v10 = vmul.f32 0.5, %v703_v20  ;;  %v3313_v15 = vld [vmem:[#allocation3 + $0x1f4] ss:$8 sps:$4 sm:$0xff]  }
 0x158   :  { %3326 = verf.f32 %v1140_v22  ;;  %v1142_v25 = vmul.f32 0.70710677, %v3783_v23  ;;  %976 = vmatprep.mubr.bf16.mxu0 %v3304_v18  ;;  %v1014_v18 = vmul.f32 0.5, %v3783_v23 }
 0x159   :  { %v3317_v26 = vpop.eup %3316  ;;  %3328 = verf.f32 %v1141_v24 }
 0x15a   :  { %v3319_v27 = vpop.eup %3318  ;;  %3330 = verf.f32 %v1142_v25  ;;  %v708_v28 = vpop.f32.mrb[8].mxu0  ;;  %v1391_v31 = vadd.f32 1.0, %v3317_v26 }
 0x15b   :  { %v3321_v29 = vpop.eup %3320  ;;  %v3787_v32 = vadd.f32 %v708_v28, %v3763_v60  ;;  %v710_v33 = vpop.f32.mrb[9].mxu0  ;;  %v1392_v40 = vadd.f32 1.0, %v3319_v27 }
 0x15c   :  { %v3323_v35 = vpop.eup %3322  ;;  %v1393_v37 = vadd.f32 1.0, %v3321_v29  ;;  %v3790_v38 = vadd.f32 %v710_v33, %v3767_v61  ;;  %v712_v39 = vpop.f32.mrb[10].mxu0  ;;  %v1519_v51 = vmul.f32 %v1391_v31, %v1007_v30 }
 0x15d   :  { %v1143_v43 = vmul.f32 0.70710677, %v3787_v32  ;;  %v3794_v44 = vadd.f32 %v712_v39, %v3763_v60  ;;  %v714_v45 = vpop.f32.mrb[11].mxu0  ;;  %v1394_v46 = vadd.f32 1.0, %v3323_v35  ;;  %v1520_v55 = vmul.f32 %v1392_v40, %v1008_v42 }
 0x15e   :  { %v1521_v47 = vmul.f32 %v1393_v37, %v1009_v36  ;;  %v1144_v49 = vmul.f32 0.70710677, %v3790_v38  ;;  %v3798_v50 = vadd.f32 %v714_v45, %v3767_v61 }
 0x15f   :  { %3332 = verf.f32 %v1143_v43  ;;  %v1145_v52 = vmul.f32 0.70710677, %v3794_v44  ;;  %977 = vmatmul.mubr.bf16.gmra.mrb[116].mxu0 %v3306_v34  ;;  %v1522_v57 = vmul.f32 %v1394_v46, %v1010_v48  ;;  %v1015_v43 = vmul.f32 0.5, %v3787_v32 }
 0x160   :  { %3334 = verf.f32 %v1144_v49  ;;  %v1146_v53 = vmul.f32 0.70710677, %v3798_v50  ;;  %986 = vmatprep.mubr.bf16.mxu0 %v3310_v41  ;;  %v1647_v62 = vpack.c.bf16 %v1521_v47, %v1519_v51  ;;  %v3315_v41 = vld [vmem:[#allocation3 + $0x1f0] ss:$8 sps:$4 sm:$0xff]   ;;  %v1017_v45 = vmul.f32 0.5, %v3794_v44 }
 0x161   :  { %v3325_v59 = vpop.eup %3324  ;;  %3336 = verf.f32 %v1145_v52  ;;  %v1648_v2 = vpack.c.bf16 %v1522_v57, %v1520_v55  ;;  %v1016_v49 = vmul.f32 0.5, %v3790_v38  ;;  %v1018_v51 = vmul.f32 0.5, %v3798_v50 }
 0x162   :  { %v3327_v63 = vpop.eup %3326  ;;  %v1395_v0 = vadd.f32 1.0, %v3325_v59  ;;  %3338 = verf.f32 %v1146_v53  ;;  %v718_v1 = vpop.f32.mrb[12].mxu0 }
 0x163   :  { %v3329_v3 = vpop.eup %3328  ;;  %v1396_v4 = vadd.f32 1.0, %v3327_v63  ;;  %v3803_v5 = vadd.f32 %v718_v1, %v3763_v60  ;;  %v720_v6 = vpop.f32.mrb[13].mxu0  ;;  %2075 = vmatprep.mubr.bf16.mxu1 %v1648_v2 }
 0x164   :  { %v3331_v8 = vpop.eup %3330  ;;  %v1397_v11 = vadd.f32 1.0, %v3329_v3  ;;  %v3807_v12 = vadd.f32 %v720_v6, %v3767_v61  ;;  %v722_v14 = vpop.f32.mrb[14].mxu0  ;;  %2076 = vmatmul.mubr.bf16.vlgmr.msra.gmra.mrb[0].mxu1 %v1647_v62  ;;  %v1523_v24 = vmul.f32 %v1395_v0, %v1011_v9 }
 0x165   :  { %v1398_v19 = vadd.f32 1.0, %v3331_v8  ;;  %v1147_v21 = vmul.f32 0.70710677, %v3803_v5  ;;  %v724_v22 = vpop.f32.mrb[15].mxu0  ;;  %v3814_v20 = vadd.f32 %v722_v14, %v3763_v60  ;;  %v1524_v26 = vmul.f32 %v1396_v4, %v1012_v17 }
 0x166   :  { %v1525_v25 = vmul.f32 %v1397_v11, %v1013_v10  ;;  %v1148_v13 = vmul.f32 0.70710677, %v3807_v12  ;;  %v3817_v28 = vadd.f32 %v724_v22, %v3767_v61  ;;  %v1019_v11 = vmul.f32 0.5, %v3803_v5 }
 0x167   :  { %v1526_v27 = vmul.f32 %v1398_v19, %v1014_v18  ;;  %3340 = verf.f32 %v1147_v21  ;;  %987 = vmatmul.mubr.bf16.gmra.mrb[120].mxu0 %v3312_v7  ;;  %v1149_v16 = vmul.f32 0.70710677, %v3814_v20  ;;  %v1020_v19 = vmul.f32 0.5, %v3807_v12 }
 0x168   :  { %3342 = verf.f32 %v1148_v13  ;;  %v1649_v23 = vpack.c.bf16 %v1525_v25, %v1523_v24  ;;  %996 = vmatprep.mubr.bf16.mxu0 %v3313_v15  ;;  %v1150_v30 = vmul.f32 0.70710677, %v3817_v28  ;;  %v1021_v21 = vmul.f32 0.5, %v3814_v20 }
 0x169   :  { %v3333_v29 = vpop.eup %3332  ;;  %v1650_v31 = vpack.c.bf16 %v1526_v27, %v1524_v26  ;;  %3344 = verf.f32 %v1149_v16  ;;  %v1022_v13 = vmul.f32 0.5, %v3817_v28 }
 0x16a   :  { %v3335_v33 = vpop.eup %3334  ;;  %v1399_v34 = vadd.f32 1.0, %v3333_v29  ;;  %v728_v35 = vpop.f32.mrb[16].mxu0  ;;  %3346 = verf.f32 %v1150_v30 }
 0x16b   :  { %v3337_v36 = vpop.eup %3336  ;;  %v1400_v37 = vadd.f32 1.0, %v3335_v33  ;;  %v3822_v39 = vadd.f32 %v728_v35, %v3763_v60  ;;  %v730_v40 = vpop.f32.mrb[17].mxu0  ;;  %2085 = vmatprep.mubr.bf16.mxu1 %v1650_v31 }
 0x16c   :  { %v3339_v42 = vpop.eup %3338  ;;  %v1401_v46 = vadd.f32 1.0, %v3337_v36  ;;  %v3827_v47 = vadd.f32 %v730_v40, %v3767_v61  ;;  %v732_v48 = vpop.f32.mrb[18].mxu0  ;;  %2086 = vmatmul.mubr.bf16.gmra.mrb[4].mxu1 %v1649_v23  ;;  %v1527_v57 = vmul.f32 %v1399_v34, %v1015_v43 }
 0x16d   :  { %v1402_v52 = vadd.f32 1.0, %v3339_v42  ;;  %v1151_v53 = vmul.f32 0.70710677, %v3822_v39  ;;  %v734_v55 = vpop.f32.mrb[19].mxu0  ;;  %v733_v44 = vadd.f32 %v732_v48, %v3763_v60  ;;  %v1528_v62 = vmul.f32 %v1400_v37, %v1016_v49 }
 0x16e   :  { %v1529_v59 = vmul.f32 %v1401_v46, %v1017_v45  ;;  %v1152_v32 = vmul.f32 0.70710677, %v3827_v47  ;;  %v3835_v0 = vadd.f32 %v734_v55, %v3767_v61  ;;  %v1023_v43 = vmul.f32 0.5, %v3822_v39 }
 0x16f   :  { %v1530_v63 = vmul.f32 %v1402_v52, %v1018_v51  ;;  %3348 = verf.f32 %v1151_v53  ;;  %997 = vmatmul.mubr.bf16.gmra.mrb[124].mxu0 %v3315_v41  ;;  %v1153_v38 = vmul.f32 0.70710677, %v733_v44  ;;  %v1024_v51 = vmul.f32 0.5, %v3827_v47 }
 0x170   :  { %3350 = verf.f32 %v1152_v32  ;;  %v1651_v50 = vpack.c.bf16 %v1529_v59, %v1527_v57  ;;  %v1154_v2 = vmul.f32 0.70710677, %v3835_v0  ;;  %v1025_v52 = vmul.f32 0.5, %v733_v44 }
 0x171   :  { %v3341_v1 = vpop.eup %3340  ;;  %v1652_v3 = vpack.c.bf16 %v1530_v63, %v1528_v62  ;;  %3352 = verf.f32 %v1153_v38  ;;  %v1026_v59 = vmul.f32 0.5, %v3835_v0 }
 0x172   :  { %v3343_v4 = vpop.eup %3342  ;;  %v738_v6 = vpop.f32.mrb[20].mxu0  ;;  %v1403_v7 = vadd.f32 1.0, %v3341_v1  ;;  %3354 = verf.f32 %v1154_v2 }
 0x173   :  { %v3839_v8 = vadd.f32 %v738_v6, %v3763_v60  ;;  %v740_v9 = vpop.f32.mrb[21].mxu0  ;;  %2095 = vmatprep.mubr.bf16.mxu1 %v1652_v3  ;;  %v3345_v10 = vpop.eup %3344  ;;  %v1404_v14 = vadd.f32 1.0, %v3343_v4 }
 0x174   :  { %v3843_v15 = vadd.f32 %v740_v9, %v3767_v61  ;;  %v742_v17 = vpop.f32.mrb[22].mxu0  ;;  %v3347_v18 = vpop.eup %3346  ;;  %v1405_v22 = vadd.f32 1.0, %v3345_v10  ;;  %2096 = vmatmul.mubr.bf16.gmra.mrb[8].mxu1 %v1651_v50  ;;  %v1531_v16 = vmul.f32 %v1403_v7, %v1019_v11 }
 0x175   :  { %v1155_v24 = vmul.f32 0.70710677, %v3839_v8  ;;  %v744_v25 = vpop.f32.mrb[23].mxu0  ;;  %v1406_v26 = vadd.f32 1.0, %v3347_v18  ;;  %v3851_v27 = vadd.f32 %v742_v17, %v3763_v60  ;;  %v1532_v20 = vmul.f32 %v1404_v14, %v1020_v19 }
 0x176   :  { %v1156_v5 = vmul.f32 0.70710677, %v3843_v15  ;;  %v1533_v23 = vmul.f32 %v1405_v22, %v1021_v21  ;;  %v3854_v12 = vadd.f32 %v744_v25, %v3767_v61  ;;  %v1027_v17 = vmul.f32 0.5, %v3839_v8 }
 0x177   :  { %3356 = verf.f32 %v1155_v24  ;;  %v1534_v29 = vmul.f32 %v1406_v26, %v1022_v13  ;;  %v1157_v30 = vmul.f32 0.70710677, %v3851_v27  ;;  %v1028_v24 = vmul.f32 0.5, %v3843_v15 }
 0x178   :  { %3358 = verf.f32 %v1156_v5  ;;  %v1158_v28 = vmul.f32 0.70710677, %v3854_v12  ;;  %v1653_v33 = vpack.c.bf16 %v1533_v23, %v1531_v16  ;;  %v1029_v25 = vmul.f32 0.5, %v3851_v27 }
 0x179   :  { %v3349_v31 = vpop.eup %3348  ;;  %3360 = verf.f32 %v1157_v30  ;;  %v1654_v36 = vpack.c.bf16 %v1534_v29, %v1532_v20  ;;  %v1030_v16 = vmul.f32 0.5, %v3854_v12 }
 0x17a   :  { %v3351_v34 = vpop.eup %3350  ;;  %v748_v35 = vpop.f32.mrb[24].mxu0  ;;  %v1407_v37 = vadd.f32 1.0, %v3349_v31  ;;  %3362 = verf.f32 %v1158_v28 }
 0x17b   :  { %v3859_v40 = vadd.f32 %v748_v35, %v3763_v60  ;;  %v750_v41 = vpop.f32.mrb[25].mxu0  ;;  %v3353_v42 = vpop.eup %3352  ;;  %v1408_v45 = vadd.f32 1.0, %v3351_v34  ;;  %2105 = vmatprep.mubr.bf16.mxu1 %v1654_v36 }
 0x17c   :  { %v3863_v46 = vadd.f32 %v750_v41, %v3767_v61  ;;  %v752_v48 = vpop.f32.mrb[26].mxu0  ;;  %v3355_v49 = vpop.eup %3354  ;;  %v1409_v53 = vadd.f32 1.0, %v3353_v42  ;;  %2106 = vmatmul.mubr.bf16.gmra.mrb[12].mxu1 %v1653_v33  ;;  %v1535_v63 = vmul.f32 %v1407_v37, %v1023_v43 }
 0x17d   :  { %v1159_v55 = vmul.f32 0.70710677, %v3859_v40  ;;  %v754_v57 = vpop.f32.mrb[27].mxu0  ;;  %v1410_v32 = vadd.f32 1.0, %v3355_v49  ;;  %v3870_v62 = vadd.f32 %v752_v48, %v3763_v60  ;;  %v1536_v47 = vmul.f32 %v1408_v45, %v1024_v51 }
 0x17e   :  { %v1160_v39 = vmul.f32 0.70710677, %v3863_v46  ;;  %v1537_v38 = vmul.f32 %v1409_v53, %v1025_v52  ;;  %v3873_v50 = vadd.f32 %v754_v57, %v3767_v61  ;;  %v1031_v48 = vmul.f32 0.5, %v3859_v40 }
 0x17f   :  { %3364 = verf.f32 %v1159_v55  ;;  %v1538_v44 = vmul.f32 %v1410_v32, %v1026_v59  ;;  %v1161_v1 = vmul.f32 0.70710677, %v3870_v62  ;;  %v1032_v55 = vmul.f32 0.5, %v3863_v46 }
 0x180   :  { %3366 = verf.f32 %v1160_v39  ;;  %v1162_v0 = vmul.f32 0.70710677, %v3873_v50  ;;  %v1655_v3 = vpack.c.bf16 %v1537_v38, %v1535_v63  ;;  %v1033_v57 = vmul.f32 0.5, %v3870_v62 }
 0x181   :  { %v3357_v2 = vpop.eup %3356  ;;  %3368 = verf.f32 %v1161_v1  ;;  %v1656_v7 = vpack.c.bf16 %v1538_v44, %v1536_v47  ;;  %v1034_v63 = vmul.f32 0.5, %v3873_v50 }
 0x182   :  { %v3359_v4 = vpop.eup %3358  ;;  %v758_v6 = vpop.f32.mrb[28].mxu0  ;;  %v1411_v9 = vadd.f32 1.0, %v3357_v2  ;;  %3370 = verf.f32 %v1162_v0 }
 0x183   :  { %v3878_v10 = vadd.f32 %v758_v6, %v3763_v60  ;;  %v760_v11 = vpop.f32.mrb[29].mxu0  ;;  %v3361_v14 = vpop.eup %3360  ;;  %v1412_v18 = vadd.f32 1.0, %v3359_v4  ;;  %2115 = vmatprep.mubr.bf16.mxu1 %v1656_v7 }
 0x184   :  { %v3882_v19 = vadd.f32 %v760_v11, %v3767_v61  ;;  %v762_v21 = vpop.f32.mrb[30].mxu0  ;;  %v3363_v22 = vpop.eup %3362  ;;  %v1413_v13 = vadd.f32 1.0, %v3361_v14  ;;  %2116 = vmatmul.mubr.bf16.gmra.mrb[16].mxu1 %v1655_v3  ;;  %v1539_v29 = vmul.f32 %v1411_v9, %v1027_v17 }
 0x185   :  { %v1163_v26 = vmul.f32 0.70710677, %v3878_v10  ;;  %v764_v5 = vpop.f32.mrb[31].mxu0  ;;  %v1414_v23 = vadd.f32 1.0, %v3363_v22  ;;  %v3890_v20 = vadd.f32 %v762_v21, %v3763_v60  ;;  %v1540_v27 = vmul.f32 %v1412_v18, %v1028_v24 }
 0x186   :  { %v1164_v8 = vmul.f32 0.70710677, %v3882_v19  ;;  %v1541_v30 = vmul.f32 %v1413_v13, %v1029_v25  ;;  %v3893_v15 = vadd.f32 %v764_v5, %v3767_v61  ;;  %v1035_v21 = vmul.f32 0.5, %v3878_v10 }
 0x187   :  { %3372 = verf.f32 %v1163_v26  ;;  %v1542_v31 = vmul.f32 %v1414_v23, %v1030_v16  ;;  %v1165_v28 = vmul.f32 0.70710677, %v3890_v20  ;;  %v1036_v26 = vmul.f32 0.5, %v3882_v19 }
 0x188   :  { %3374 = verf.f32 %v1164_v8  ;;  %v1166_v12 = vmul.f32 0.70710677, %v3893_v15  ;;  %v1657_v34 = vpack.c.bf16 %v1541_v30, %v1539_v29  ;;  %v1037_v5 = vmul.f32 0.5, %v3890_v20 }
 0x189   :  { %v3365_v33 = vpop.eup %3364  ;;  %3376 = verf.f32 %v1165_v28  ;;  %v1658_v37 = vpack.c.bf16 %v1542_v31, %v1540_v27  ;;  %v1038_v29 = vmul.f32 0.5, %v3893_v15 }
 0x18a   :  { %v3367_v35 = vpop.eup %3366  ;;  %v768_v36 = vpop.f32.mrb[32].mxu0  ;;  %v1415_v41 = vadd.f32 1.0, %v3365_v33  ;;  %3378 = verf.f32 %v1166_v12 }
 0x18b   :  { %v3898_v42 = vadd.f32 %v768_v36, %v3763_v60  ;;  %v770_v43 = vpop.f32.mrb[33].mxu0  ;;  %v3369_v45 = vpop.eup %3368  ;;  %v1416_v49 = vadd.f32 1.0, %v3367_v35  ;;  %2125 = vmatprep.mubr.bf16.mxu1 %v1658_v37 }
 0x18c   :  { %v3902_v51 = vadd.f32 %v770_v43, %v3767_v61  ;;  %v772_v52 = vpop.f32.mrb[34].mxu0  ;;  %v3371_v53 = vpop.eup %3370  ;;  %v1417_v59 = vadd.f32 1.0, %v3369_v45  ;;  %2126 = vmatmul.mubr.bf16.gmra.mrb[20].mxu1 %v1657_v34  ;;  %v1543_v44 = vmul.f32 %v1415_v41, %v1031_v48 }
 0x18d   :  { %v1167_v32 = vmul.f32 0.70710677, %v3898_v42  ;;  %v774_v39 = vpop.f32.mrb[35].mxu0  ;;  %v1418_v38 = vadd.f32 1.0, %v3371_v53  ;;  %v3910_v47 = vadd.f32 %v772_v52, %v3763_v60  ;;  %v1544_v62 = vmul.f32 %v1416_v49, %v1032_v55 }
 0x18e   :  { %v1168_v40 = vmul.f32 0.70710677, %v3902_v51  ;;  %v1545_v1 = vmul.f32 %v1417_v59, %v1033_v57  ;;  %v3913_v46 = vadd.f32 %v774_v39, %v3767_v61  ;;  %v1039_v52 = vmul.f32 0.5, %v3898_v42 }
 0x18f   :  { %3380 = verf.f32 %v1167_v32  ;;  %v1546_v2 = vmul.f32 %v1418_v38, %v1034_v63  ;;  %v1169_v0 = vmul.f32 0.70710677, %v3910_v47  ;;  %v1040_v32 = vmul.f32 0.5, %v3902_v51 }
 0x190   :  { %3382 = verf.f32 %v1168_v40  ;;  %v1170_v50 = vmul.f32 0.70710677, %v3913_v46  ;;  %v1659_v4 = vpack.c.bf16 %v1545_v1, %v1543_v44  ;;  %v1041_v39 = vmul.f32 0.5, %v3910_v47 }
 0x191   :  { %v3373_v3 = vpop.eup %3372  ;;  %3384 = verf.f32 %v1169_v0  ;;  %v1660_v9 = vpack.c.bf16 %v1546_v2, %v1544_v62  ;;  %v1042_v44 = vmul.f32 0.5, %v3913_v46 }
 0x192   :  { %v3375_v6 = vpop.eup %3374  ;;  %v778_v7 = vpop.f32.mrb[36].mxu0  ;;  %v1419_v11 = vadd.f32 1.0, %v3373_v3  ;;  %3386 = verf.f32 %v1170_v50 }
 0x193   :  { %v3918_v14 = vadd.f32 %v778_v7, %v3763_v60  ;;  %v780_v17 = vpop.f32.mrb[37].mxu0  ;;  %v3377_v18 = vpop.eup %3376  ;;  %v1420_v22 = vadd.f32 1.0, %v3375_v6  ;;  %2135 = vmatprep.mubr.bf16.mxu1 %v1660_v9 }
 0x194   :  { %v3922_v24 = vadd.f32 %v780_v17, %v3767_v61  ;;  %v782_v25 = vpop.f32.mrb[38].mxu0  ;;  %v3379_v13 = vpop.eup %3378  ;;  %v1421_v16 = vadd.f32 1.0, %v3377_v18  ;;  %2136 = vmatmul.mubr.bf16.gmra.mrb[24].mxu1 %v1659_v4  ;;  %v1547_v31 = vmul.f32 %v1419_v11, %v1035_v21 }
 0x195   :  { %v1171_v23 = vmul.f32 0.70710677, %v3918_v14  ;;  %v784_v8 = vpop.f32.mrb[39].mxu0  ;;  %v1422_v30 = vadd.f32 1.0, %v3379_v13  ;;  %v3930_v27 = vadd.f32 %v782_v25, %v3763_v60  ;;  %v1548_v20 = vmul.f32 %v1420_v22, %v1036_v26 }
 0x196   :  { %v1172_v10 = vmul.f32 0.70710677, %v3922_v24  ;;  %v1549_v28 = vmul.f32 %v1421_v16, %v1037_v5  ;;  %v3933_v19 = vadd.f32 %v784_v8, %v3767_v61  ;;  %v1043_v25 = vmul.f32 0.5, %v3918_v14 }
 0x197   :  { %3388 = verf.f32 %v1171_v23  ;;  %v1550_v33 = vmul.f32 %v1422_v30, %v1038_v29  ;;  %v1173_v12 = vmul.f32 0.70710677, %v3930_v27  ;;  %v1044_v23 = vmul.f32 0.5, %v3922_v24 }
 0x198   :  { %3390 = verf.f32 %v1172_v10  ;;  %v1174_v15 = vmul.f32 0.70710677, %v3933_v19  ;;  %v1661_v35 = vpack.c.bf16 %v1549_v28, %v1547_v31  ;;  %v1045_v8 = vmul.f32 0.5, %v3930_v27 }
 0x199   :  { %v3381_v34 = vpop.eup %3380  ;;  %3392 = verf.f32 %v1173_v12  ;;  %v1662_v41 = vpack.c.bf16 %v1550_v33, %v1548_v20  ;;  %v1046_v31 = vmul.f32 0.5, %v3933_v19 }
 0x19a   :  { %v3383_v36 = vpop.eup %3382  ;;  %v788_v37 = vpop.f32.mrb[40].mxu0  ;;  %v1423_v43 = vadd.f32 1.0, %v3381_v34  ;;  %3394 = verf.f32 %v1174_v15 }
 0x19b   :  { %v3938_v45 = vadd.f32 %v788_v37, %v3763_v60  ;;  %v790_v48 = vpop.f32.mrb[41].mxu0  ;;  %v3385_v49 = vpop.eup %3384  ;;  %v1424_v53 = vadd.f32 1.0, %v3383_v36  ;;  %2145 = vmatprep.mubr.bf16.mxu1 %v1662_v41 }
 0x19c   :  { %v3942_v55 = vadd.f32 %v790_v48, %v3767_v61  ;;  %v792_v57 = vpop.f32.mrb[42].mxu0  ;;  %v3387_v59 = vpop.eup %3386  ;;  %v1425_v63 = vadd.f32 1.0, %v3385_v49  ;;  %2146 = vmatmul.mubr.bf16.gmra.mrb[28].mxu1 %v1661_v35  ;;  %v1551_v2 = vmul.f32 %v1423_v43, %v1039_v52 }
 0x19d   :  { %v1175_v38 = vmul.f32 0.70710677, %v3938_v45  ;;  %v794_v40 = vpop.f32.mrb[43].mxu0  ;;  %v1426_v1 = vadd.f32 1.0, %v3387_v59  ;;  %v3950_v62 = vadd.f32 %v792_v57, %v3763_v60  ;;  %v1552_v47 = vmul.f32 %v1424_v53, %v1040_v32 }
 0x19e   :  { %v1176_v42 = vmul.f32 0.70710677, %v3942_v55  ;;  %v1553_v0 = vmul.f32 %v1425_v63, %v1041_v39  ;;  %v3953_v51 = vadd.f32 %v794_v40, %v3767_v61  ;;  %v1047_v57 = vmul.f32 0.5, %v3938_v45 }
 0x19f   :  { %3396 = verf.f32 %v1175_v38  ;;  %v1554_v3 = vmul.f32 %v1426_v1, %v1042_v44  ;;  %v1177_v50 = vmul.f32 0.70710677, %v3950_v62  ;;  %v1048_v38 = vmul.f32 0.5, %v3942_v55 }
 0x1a0   :  { %3398 = verf.f32 %v1176_v42  ;;  %v1178_v46 = vmul.f32 0.70710677, %v3953_v51  ;;  %v1663_v6 = vpack.c.bf16 %v1553_v0, %v1551_v2  ;;  %v1049_v40 = vmul.f32 0.5, %v3950_v62 }
 0x1a1   :  { %v3389_v4 = vpop.eup %3388  ;;  %3400 = verf.f32 %v1177_v50  ;;  %v1664_v11 = vpack.c.bf16 %v1554_v3, %v1552_v47  ;;  %v1050_v2 = vmul.f32 0.5, %v3953_v51 }
 0x1a2   :  { %v3391_v7 = vpop.eup %3390  ;;  %v798_v9 = vpop.f32.mrb[44].mxu0  ;;  %v1427_v17 = vadd.f32 1.0, %v3389_v4  ;;  %3402 = verf.f32 %v1178_v46 }
 0x1a3   :  { %v3958_v18 = vadd.f32 %v798_v9, %v3763_v60  ;;  %v800_v21 = vpop.f32.mrb[45].mxu0  ;;  %v3393_v22 = vpop.eup %3392  ;;  %v1428_v13 = vadd.f32 1.0, %v3391_v7  ;;  %2155 = vmatprep.mubr.bf16.mxu1 %v1664_v11 }
 0x1a4   :  { %v3962_v26 = vadd.f32 %v800_v21, %v3767_v61  ;;  %v802_v5 = vpop.f32.mrb[46].mxu0  ;;  %v3395_v16 = vpop.eup %3394  ;;  %v1429_v29 = vadd.f32 1.0, %v3393_v22  ;;  %2156 = vmatmul.mubr.bf16.gmra.mrb[32].mxu1 %v1663_v6  ;;  %v1555_v33 = vmul.f32 %v1427_v17, %v1043_v25 }
 0x1a5   :  { %v1179_v30 = vmul.f32 0.70710677, %v3958_v18  ;;  %v804_v10 = vpop.f32.mrb[47].mxu0  ;;  %v1430_v28 = vadd.f32 1.0, %v3395_v16  ;;  %v3970_v20 = vadd.f32 %v802_v5, %v3763_v60  ;;  %v1556_v27 = vmul.f32 %v1428_v13, %v1044_v23 }
 0x1a6   :  { %v1180_v14 = vmul.f32 0.70710677, %v3962_v26  ;;  %v1557_v12 = vmul.f32 %v1429_v29, %v1045_v8  ;;  %v3973_v24 = vadd.f32 %v804_v10, %v3767_v61  ;;  %v1051_v5 = vmul.f32 0.5, %v3958_v18 }
 0x1a7   :  { %3404 = verf.f32 %v1179_v30  ;;  %v1558_v34 = vmul.f32 %v1430_v28, %v1046_v31  ;;  %v1181_v15 = vmul.f32 0.70710677, %v3970_v20  ;;  %v1052_v30 = vmul.f32 0.5, %v3962_v26 }
 0x1a8   :  { %3406 = verf.f32 %v1180_v14  ;;  %v1182_v19 = vmul.f32 0.70710677, %v3973_v24  ;;  %v1665_v36 = vpack.c.bf16 %v1557_v12, %v1555_v33  ;;  %v1053_v10 = vmul.f32 0.5, %v3970_v20 }
 0x1a9   :  { %v3397_v35 = vpop.eup %3396  ;;  %3408 = verf.f32 %v1181_v15  ;;  %v1666_v43 = vpack.c.bf16 %v1558_v34, %v1556_v27  ;;  %v1054_v33 = vmul.f32 0.5, %v3973_v24 }
 0x1aa   :  { %v3399_v37 = vpop.eup %3398  ;;  %v808_v41 = vpop.f32.mrb[48].mxu0  ;;  %v1431_v48 = vadd.f32 1.0, %v3397_v35  ;;  %3410 = verf.f32 %v1182_v19 }
 0x1ab   :  { %v3978_v49 = vadd.f32 %v808_v41, %v3763_v60  ;;  %v810_v52 = vpop.f32.mrb[49].mxu0  ;;  %v3401_v53 = vpop.eup %3400  ;;  %v1432_v59 = vadd.f32 1.0, %v3399_v37  ;;  %2165 = vmatprep.mubr.bf16.mxu1 %v1666_v43 }
 0x1ac   :  { %v3982_v32 = vadd.f32 %v810_v52, %v3767_v61  ;;  %v812_v39 = vpop.f32.mrb[50].mxu0  ;;  %v3403_v63 = vpop.eup %3402  ;;  %v1433_v44 = vadd.f32 1.0, %v3401_v53  ;;  %2166 = vmatmul.mubr.bf16.gmra.mrb[36].mxu1 %v1665_v36  ;;  %v1559_v3 = vmul.f32 %v1431_v48, %v1047_v57 }
 0x1ad   :  { %v1183_v1 = vmul.f32 0.70710677, %v3978_v49  ;;  %v814_v42 = vpop.f32.mrb[51].mxu0  ;;  %v1434_v0 = vadd.f32 1.0, %v3403_v63  ;;  %v3990_v47 = vadd.f32 %v812_v39, %v3763_v60  ;;  %v1560_v62 = vmul.f32 %v1432_v59, %v1048_v38 }
 0x1ae   :  { %v1184_v45 = vmul.f32 0.70710677, %v3982_v32  ;;  %v1561_v50 = vmul.f32 %v1433_v44, %v1049_v40  ;;  %v3993_v55 = vadd.f32 %v814_v42, %v3767_v61  ;;  %v1055_v39 = vmul.f32 0.5, %v3978_v49 }
 0x1af   :  { %3412 = verf.f32 %v1183_v1  ;;  %v1562_v4 = vmul.f32 %v1434_v0, %v1050_v2  ;;  %v1185_v46 = vmul.f32 0.70710677, %v3990_v47  ;;  %v1056_v1 = vmul.f32 0.5, %v3982_v32 }
 0x1b0   :  { %3414 = verf.f32 %v1184_v45  ;;  %v1186_v51 = vmul.f32 0.70710677, %v3993_v55  ;;  %v1667_v7 = vpack.c.bf16 %v1561_v50, %v1559_v3  ;;  %v1057_v42 = vmul.f32 0.5, %v3990_v47 }
 0x1b1   :  { %v3405_v6 = vpop.eup %3404  ;;  %3416 = verf.f32 %v1185_v46  ;;  %v1668_v17 = vpack.c.bf16 %v1562_v4, %v1560_v62  ;;  %v1058_v3 = vmul.f32 0.5, %v3993_v55 }
 0x1b2   :  { %v3407_v9 = vpop.eup %3406  ;;  %v818_v11 = vpop.f32.mrb[52].mxu0  ;;  %v1435_v21 = vadd.f32 1.0, %v3405_v6  ;;  %3418 = verf.f32 %v1186_v51 }
 0x1b3   :  { %v3998_v22 = vadd.f32 %v818_v11, %v3763_v60  ;;  %v820_v25 = vpop.f32.mrb[53].mxu0  ;;  %v3409_v13 = vpop.eup %3408  ;;  %v1436_v16 = vadd.f32 1.0, %v3407_v9  ;;  %2175 = vmatprep.mubr.bf16.mxu1 %v1668_v17 }
 0x1b4   :  { %v4002_v23 = vadd.f32 %v820_v25, %v3767_v61  ;;  %v822_v8 = vpop.f32.mrb[54].mxu0  ;;  %v3411_v29 = vpop.eup %3410  ;;  %v1437_v31 = vadd.f32 1.0, %v3409_v13  ;;  %2176 = vmatmul.mubr.bf16.gmra.mrb[40].mxu1 %v1667_v7  ;;  %v1563_v34 = vmul.f32 %v1435_v21, %v1051_v5 }
 0x1b5   :  { %v1187_v28 = vmul.f32 0.70710677, %v3998_v22  ;;  %v824_v14 = vpop.f32.mrb[55].mxu0  ;;  %v1438_v12 = vadd.f32 1.0, %v3411_v29  ;;  %v4010_v27 = vadd.f32 %v822_v8, %v3763_v60  ;;  %v1564_v20 = vmul.f32 %v1436_v16, %v1052_v30 }
 0x1b6   :  { %v1188_v18 = vmul.f32 0.70710677, %v4002_v23  ;;  %v1565_v15 = vmul.f32 %v1437_v31, %v1053_v10  ;;  %v4013_v26 = vadd.f32 %v824_v14, %v3767_v61  ;;  %v1059_v8 = vmul.f32 0.5, %v3998_v22 }
 0x1b7   :  { %3420 = verf.f32 %v1187_v28  ;;  %v1566_v35 = vmul.f32 %v1438_v12, %v1054_v33  ;;  %v1189_v19 = vmul.f32 0.70710677, %v4010_v27  ;;  %v1060_v28 = vmul.f32 0.5, %v4002_v23 }
 0x1b8   :  { %3422 = verf.f32 %v1188_v18  ;;  %v1190_v24 = vmul.f32 0.70710677, %v4013_v26  ;;  %v1669_v37 = vpack.c.bf16 %v1565_v15, %v1563_v34  ;;  %v1061_v14 = vmul.f32 0.5, %v4010_v27 }
 0x1b9   :  { %v3413_v36 = vpop.eup %3412  ;;  %3424 = verf.f32 %v1189_v19  ;;  %v1670_v48 = vpack.c.bf16 %v1566_v35, %v1564_v20  ;;  %v1062_v34 = vmul.f32 0.5, %v4013_v26 }
 0x1ba   :  { %v3415_v41 = vpop.eup %3414  ;;  %v828_v43 = vpop.f32.mrb[56].mxu0  ;;  %v1439_v52 = vadd.f32 1.0, %v3413_v36  ;;  %3426 = verf.f32 %v1190_v24 }
 0x1bb   :  { %v4018_v53 = vadd.f32 %v828_v43, %v3763_v60  ;;  %v830_v57 = vpop.f32.mrb[57].mxu0  ;;  %v3417_v59 = vpop.eup %3416  ;;  %v1440_v63 = vadd.f32 1.0, %v3415_v41  ;;  %2185 = vmatprep.mubr.bf16.mxu1 %v1670_v48 }
 0x1bc   :  { %v4022_v38 = vadd.f32 %v830_v57, %v3767_v61  ;;  %v832_v40 = vpop.f32.mrb[58].mxu0  ;;  %v3419_v44 = vpop.eup %3418  ;;  %v1441_v2 = vadd.f32 1.0, %v3417_v59  ;;  %2186 = vmatmul.mubr.bf16.gmra.mrb[44].mxu1 %v1669_v37  ;;  %v1567_v4 = vmul.f32 %v1439_v52, %v1055_v39 }
 0x1bd   :  { %v1191_v0 = vmul.f32 0.70710677, %v4018_v53  ;;  %v834_v45 = vpop.f32.mrb[59].mxu0  ;;  %v1442_v50 = vadd.f32 1.0, %v3419_v44  ;;  %v4030_v62 = vadd.f32 %v832_v40, %v3763_v60  ;;  %v1568_v47 = vmul.f32 %v1440_v63, %v1056_v1 }
 0x1be   :  { %v1192_v49 = vmul.f32 0.70710677, %v4022_v38  ;;  %v1569_v46 = vmul.f32 %v1441_v2, %v1057_v42  ;;  %v4033_v32 = vadd.f32 %v834_v45, %v3767_v61  ;;  %v1063_v40 = vmul.f32 0.5, %v4018_v53 }
 0x1bf   :  { %3428 = verf.f32 %v1191_v0  ;;  %v1570_v6 = vmul.f32 %v1442_v50, %v1058_v3  ;;  %v1193_v51 = vmul.f32 0.70710677, %v4030_v62  ;;  %v1064_v0 = vmul.f32 0.5, %v4022_v38 }
 0x1c0   :  { %3430 = verf.f32 %v1192_v49  ;;  %v1194_v55 = vmul.f32 0.70710677, %v4033_v32  ;;  %v1671_v9 = vpack.c.bf16 %v1569_v46, %v1567_v4  ;;  %v1065_v45 = vmul.f32 0.5, %v4030_v62 }
 0x1c1   :  { %v3421_v7 = vpop.eup %3420  ;;  %3432 = verf.f32 %v1193_v51  ;;  %v1672_v21 = vpack.c.bf16 %v1570_v6, %v1568_v47  ;;  %v1066_v4 = vmul.f32 0.5, %v4033_v32 }
 0x1c2   :  { %v3423_v11 = vpop.eup %3422  ;;  %v838_v17 = vpop.f32.mrb[60].mxu0  ;;  %v1443_v25 = vadd.f32 1.0, %v3421_v7  ;;  %3434 = verf.f32 %v1194_v55 }
 0x1c3   :  { %v4038_v13 = vadd.f32 %v838_v17, %v3763_v60  ;;  %v840_v5 = vpop.f32.mrb[61].mxu0  ;;  %v3425_v16 = vpop.eup %3424  ;;  %v1444_v29 = vadd.f32 1.0, %v3423_v11  ;;  %2195 = vmatprep.mubr.bf16.mxu1 %v1672_v21 }
 0x1c4   :  { %v4042_v30 = vadd.f32 %v840_v5, %v3767_v61  ;;  %v842_v10 = vpop.f32.mrb[62].mxu0  ;;  %v3427_v31 = vpop.eup %3426  ;;  %v1445_v33 = vadd.f32 1.0, %v3425_v16  ;;  %2196 = vmatmul.mubr.bf16.gmra.mrb[48].mxu1 %v1671_v9  ;;  %v1571_v35 = vmul.f32 %v1443_v25, %v1059_v8 }
 0x1c5   :  { %v1195_v12 = vmul.f32 0.70710677, %v4038_v13  ;;  %v844_v18 = vpop.f32.mrb[63].mxu0  ;;  %v1446_v15 = vadd.f32 1.0, %v3427_v31  ;;  %v4050_v20 = vadd.f32 %v842_v10, %v3763_v60  ;;  %v1572_v27 = vmul.f32 %v1444_v29, %v1060_v28 }
 0x1c6   :  { %v1196_v22 = vmul.f32 0.70710677, %v4042_v30  ;;  %v1573_v19 = vmul.f32 %v1445_v33, %v1061_v14  ;;  %v4053_v23 = vadd.f32 %v844_v18, %v3767_v61  ;;  %v1067_v10 = vmul.f32 0.5, %v4038_v13 }
 0x1c7   :  { %3436 = verf.f32 %v1195_v12  ;;  %v1574_v36 = vmul.f32 %v1446_v15, %v1062_v34  ;;  %v1197_v24 = vmul.f32 0.70710677, %v4050_v20  ;;  %v1068_v12 = vmul.f32 0.5, %v4042_v30 }
 0x1c8   :  { %3438 = verf.f32 %v1196_v22  ;;  %v1198_v26 = vmul.f32 0.70710677, %v4053_v23  ;;  %v1673_v41 = vpack.c.bf16 %v1573_v19, %v1571_v35  ;;  %v1069_v18 = vmul.f32 0.5, %v4050_v20 }
 0x1c9   :  { %v3429_v37 = vpop.eup %3428  ;;  %3440 = verf.f32 %v1197_v24  ;;  %v1674_v52 = vpack.c.bf16 %v1574_v36, %v1572_v27  ;;  %v1070_v35 = vmul.f32 0.5, %v4053_v23 }
 0x1ca   :  { %v3431_v43 = vpop.eup %3430  ;;  %v848_v48 = vpop.f32.mrb[64].mxu0  ;;  %v1447_v57 = vadd.f32 1.0, %v3429_v37  ;;  %3442 = verf.f32 %v1198_v26 }
 0x1cb   :  { %v4058_v59 = vadd.f32 %v848_v48, %v3763_v60  ;;  %v850_v39 = vpop.f32.mrb[65].mxu0  ;;  %v3433_v63 = vpop.eup %3432  ;;  %v1448_v44 = vadd.f32 1.0, %v3431_v43  ;;  %2205 = vmatprep.mubr.bf16.mxu1 %v1674_v52 }
 0x1cc   :  { %v4062_v1 = vadd.f32 %v850_v39, %v3767_v61  ;;  %v852_v42 = vpop.f32.mrb[66].mxu0  ;;  %v3435_v2 = vpop.eup %3434  ;;  %v1449_v3 = vadd.f32 1.0, %v3433_v63  ;;  %2206 = vmatmul.mubr.bf16.gmra.mrb[52].mxu1 %v1673_v41  ;;  %v1575_v6 = vmul.f32 %v1447_v57, %v1063_v40 }
 0x1cd   :  { %v1199_v50 = vmul.f32 0.70710677, %v4058_v59  ;;  %v854_v49 = vpop.f32.mrb[67].mxu0  ;;  %v1450_v46 = vadd.f32 1.0, %v3435_v2  ;;  %v4070_v47 = vadd.f32 %v852_v42, %v3763_v60  ;;  %v1576_v62 = vmul.f32 %v1448_v44, %v1064_v0 }
 0x1ce   :  { %v1200_v53 = vmul.f32 0.70710677, %v4062_v1  ;;  %v1577_v51 = vmul.f32 %v1449_v3, %v1065_v45  ;;  %v4073_v38 = vadd.f32 %v854_v49, %v3767_v61  ;;  %v1071_v42 = vmul.f32 0.5, %v4058_v59 }
 0x1cf   :  { %3444 = verf.f32 %v1199_v50  ;;  %v1578_v7 = vmul.f32 %v1450_v46, %v1066_v4  ;;  %v1201_v55 = vmul.f32 0.70710677, %v4070_v47  ;;  %v1072_v50 = vmul.f32 0.5, %v4062_v1 }
 0x1d0   :  { %3446 = verf.f32 %v1200_v53  ;;  %v1202_v32 = vmul.f32 0.70710677, %v4073_v38  ;;  %v1675_v11 = vpack.c.bf16 %v1577_v51, %v1575_v6  ;;  %v1073_v49 = vmul.f32 0.5, %v4070_v47 }
 0x1d1   :  { %v3437_v9 = vpop.eup %3436  ;;  %3448 = verf.f32 %v1201_v55  ;;  %v1676_v25 = vpack.c.bf16 %v1578_v7, %v1576_v62  ;;  %v1074_v6 = vmul.f32 0.5, %v4073_v38 }
 0x1d2   :  { %v3439_v17 = vpop.eup %3438  ;;  %v858_v21 = vpop.f32.mrb[68].mxu0  ;;  %v1451_v5 = vadd.f32 1.0, %v3437_v9  ;;  %3450 = verf.f32 %v1202_v32 }
 0x1d3   :  { %v4078_v16 = vadd.f32 %v858_v21, %v3763_v60  ;;  %v860_v8 = vpop.f32.mrb[69].mxu0  ;;  %v3441_v29 = vpop.eup %3440  ;;  %v1452_v31 = vadd.f32 1.0, %v3439_v17  ;;  %2215 = vmatprep.mubr.bf16.mxu1 %v1676_v25 }
 0x1d4   :  { %v4082_v28 = vadd.f32 %v860_v8, %v3767_v61  ;;  %v862_v14 = vpop.f32.mrb[70].mxu0  ;;  %v3443_v33 = vpop.eup %3442  ;;  %v1453_v34 = vadd.f32 1.0, %v3441_v29  ;;  %2216 = vmatmul.mubr.bf16.gmra.mrb[56].mxu1 %v1675_v11  ;;  %v1579_v36 = vmul.f32 %v1451_v5, %v1067_v10 }
 0x1d5   :  { %v1203_v15 = vmul.f32 0.70710677, %v4078_v16  ;;  %v864_v22 = vpop.f32.mrb[71].mxu0  ;;  %v1454_v19 = vadd.f32 1.0, %v3443_v33  ;;  %v4090_v27 = vadd.f32 %v862_v14, %v3763_v60  ;;  %v1580_v20 = vmul.f32 %v1452_v31, %v1068_v12 }
 0x1d6   :  { %v1204_v13 = vmul.f32 0.70710677, %v4082_v28  ;;  %v1581_v24 = vmul.f32 %v1453_v34, %v1069_v18  ;;  %v4093_v30 = vadd.f32 %v864_v22, %v3767_v61  ;;  %v1075_v14 = vmul.f32 0.5, %v4078_v16 }
 0x1d7   :  { %3452 = verf.f32 %v1203_v15  ;;  %v1582_v37 = vmul.f32 %v1454_v19, %v1070_v35  ;;  %v1205_v26 = vmul.f32 0.70710677, %v4090_v27  ;;  %v1076_v15 = vmul.f32 0.5, %v4082_v28 }
 0x1d8   :  { %3454 = verf.f32 %v1204_v13  ;;  %v1206_v23 = vmul.f32 0.70710677, %v4093_v30  ;;  %v1677_v43 = vpack.c.bf16 %v1581_v24, %v1579_v36  ;;  %v1077_v22 = vmul.f32 0.5, %v4090_v27 }
 0x1d9   :  { %v3445_v41 = vpop.eup %3444  ;;  %3456 = verf.f32 %v1205_v26  ;;  %v1678_v57 = vpack.c.bf16 %v1582_v37, %v1580_v20  ;;  %v1078_v36 = vmul.f32 0.5, %v4093_v30 }
 0x1da   :  { %v3447_v48 = vpop.eup %3446  ;;  %v868_v52 = vpop.f32.mrb[72].mxu0  ;;  %v1455_v39 = vadd.f32 1.0, %v3445_v41  ;;  %3458 = verf.f32 %v1206_v23 }
 0x1db   :  { %v4098_v63 = vadd.f32 %v868_v52, %v3763_v60  ;;  %v870_v40 = vpop.f32.mrb[73].mxu0  ;;  %v3449_v44 = vpop.eup %3448  ;;  %v1456_v2 = vadd.f32 1.0, %v3447_v48  ;;  %2225 = vmatprep.mubr.bf16.mxu1 %v1678_v57 }
 0x1dc   :  { %v4102_v0 = vadd.f32 %v870_v40, %v3767_v61  ;;  %v872_v45 = vpop.f32.mrb[74].mxu0  ;;  %v3451_v3 = vpop.eup %3450  ;;  %v1457_v4 = vadd.f32 1.0, %v3449_v44  ;;  %2226 = vmatmul.mubr.bf16.gmra.mrb[60].mxu1 %v1677_v43  ;;  %v1583_v7 = vmul.f32 %v1455_v39, %v1071_v42 }
 0x1dd   :  { %v1207_v46 = vmul.f32 0.70710677, %v4098_v63  ;;  %v874_v53 = vpop.f32.mrb[75].mxu0  ;;  %v1458_v51 = vadd.f32 1.0, %v3451_v3  ;;  %v4110_v62 = vadd.f32 %v872_v45, %v3763_v60  ;;  %v1584_v47 = vmul.f32 %v1456_v2, %v1072_v50 }
 0x1de   :  { %v1208_v59 = vmul.f32 0.70710677, %v4102_v0  ;;  %v1585_v55 = vmul.f32 %v1457_v4, %v1073_v49  ;;  %v4113_v1 = vadd.f32 %v874_v53, %v3767_v61  ;;  %v1079_v45 = vmul.f32 0.5, %v4098_v63 }
 0x1df   :  { %3460 = verf.f32 %v1207_v46  ;;  %v1586_v9 = vmul.f32 %v1458_v51, %v1074_v6  ;;  %v1209_v32 = vmul.f32 0.70710677, %v4110_v62  ;;  %v1080_v46 = vmul.f32 0.5, %v4102_v0 }
 0x1e0   :  { %3462 = verf.f32 %v1208_v59  ;;  %v1210_v38 = vmul.f32 0.70710677, %v4113_v1  ;;  %v1679_v17 = vpack.c.bf16 %v1585_v55, %v1583_v7  ;;  %v1081_v53 = vmul.f32 0.5, %v4110_v62 }
 0x1e1   :  { %v3453_v11 = vpop.eup %3452  ;;  %3464 = verf.f32 %v1209_v32  ;;  %v1680_v5 = vpack.c.bf16 %v1586_v9, %v1584_v47  ;;  %v1082_v7 = vmul.f32 0.5, %v4113_v1 }
 0x1e2   :  { %v3455_v21 = vpop.eup %3454  ;;  %v878_v25 = vpop.f32.mrb[76].mxu0  ;;  %v1459_v8 = vadd.f32 1.0, %v3453_v11  ;;  %3466 = verf.f32 %v1210_v38 }
 0x1e3   :  { %v4118_v29 = vadd.f32 %v878_v25, %v3763_v60  ;;  %v880_v10 = vpop.f32.mrb[77].mxu0  ;;  %v3457_v31 = vpop.eup %3456  ;;  %v1460_v33 = vadd.f32 1.0, %v3455_v21  ;;  %2235 = vmatprep.mubr.bf16.mxu1 %v1680_v5 }
 0x1e4   :  { %v4122_v12 = vadd.f32 %v880_v10, %v3767_v61  ;;  %v882_v18 = vpop.f32.mrb[78].mxu0  ;;  %v3459_v34 = vpop.eup %3458  ;;  %v1461_v35 = vadd.f32 1.0, %v3457_v31  ;;  %2236 = vmatmul.mubr.bf16.gmra.mrb[64].mxu1 %v1679_v17  ;;  %v1587_v37 = vmul.f32 %v1459_v8, %v1075_v14 }
 0x1e5   :  { %v1211_v19 = vmul.f32 0.70710677, %v4118_v29  ;;  %v884_v13 = vpop.f32.mrb[79].mxu0  ;;  %v1462_v24 = vadd.f32 1.0, %v3459_v34  ;;  %v4130_v20 = vadd.f32 %v882_v18, %v3763_v60  ;;  %v1588_v27 = vmul.f32 %v1460_v33, %v1076_v15 }
 0x1e6   :  { %v1212_v16 = vmul.f32 0.70710677, %v4122_v12  ;;  %v1589_v26 = vmul.f32 %v1461_v35, %v1077_v22  ;;  %v4133_v28 = vadd.f32 %v884_v13, %v3767_v61  ;;  %v1083_v18 = vmul.f32 0.5, %v4118_v29 }
 0x1e7   :  { %3468 = verf.f32 %v1211_v19  ;;  %v1590_v41 = vmul.f32 %v1462_v24, %v1078_v36  ;;  %v1213_v23 = vmul.f32 0.70710677, %v4130_v20  ;;  %v1084_v19 = vmul.f32 0.5, %v4122_v12 }
 0x1e8   :  { %3470 = verf.f32 %v1212_v16  ;;  %v1214_v30 = vmul.f32 0.70710677, %v4133_v28  ;;  %v1681_v48 = vpack.c.bf16 %v1589_v26, %v1587_v37  ;;  %v1085_v13 = vmul.f32 0.5, %v4130_v20 }
 0x1e9   :  { %v3461_v43 = vpop.eup %3460  ;;  %3472 = verf.f32 %v1213_v23  ;;  %v1682_v39 = vpack.c.bf16 %v1590_v41, %v1588_v27  ;;  %v1086_v37 = vmul.f32 0.5, %v4133_v28 }
 0x1ea   :  { %v3463_v52 = vpop.eup %3462  ;;  %v888_v57 = vpop.f32.mrb[80].mxu0  ;;  %v1463_v40 = vadd.f32 1.0, %v3461_v43  ;;  %3474 = verf.f32 %v1214_v30 }
 0x1eb   :  { %v4138_v44 = vadd.f32 %v888_v57, %v3763_v60  ;;  %v890_v42 = vpop.f32.mrb[81].mxu0  ;;  %v3465_v2 = vpop.eup %3464  ;;  %v1464_v3 = vadd.f32 1.0, %v3463_v52  ;;  %2245 = vmatprep.mubr.bf16.mxu1 %v1682_v39 }
 0x1ec   :  { %v4142_v50 = vadd.f32 %v890_v42, %v3767_v61  ;;  %v892_v49 = vpop.f32.mrb[82].mxu0  ;;  %v3467_v4 = vpop.eup %3466  ;;  %v1465_v6 = vadd.f32 1.0, %v3465_v2  ;;  %2246 = vmatmul.mubr.bf16.gmra.mrb[68].mxu1 %v1681_v48  ;;  %v1591_v9 = vmul.f32 %v1463_v40, %v1079_v45 }
 0x1ed   :  { %v1215_v51 = vmul.f32 0.70710677, %v4138_v44  ;;  %v894_v59 = vpop.f32.mrb[83].mxu0  ;;  %v1466_v55 = vadd.f32 1.0, %v3467_v4  ;;  %v4150_v47 = vadd.f32 %v892_v49, %v3763_v60  ;;  %v1592_v62 = vmul.f32 %v1464_v3, %v1080_v46 }
 0x1ee   :  { %v1216_v63 = vmul.f32 0.70710677, %v4142_v50  ;;  %v1593_v32 = vmul.f32 %v1465_v6, %v1081_v53  ;;  %v4153_v0 = vadd.f32 %v894_v59, %v3767_v61  ;;  %v1087_v49 = vmul.f32 0.5, %v4138_v44 }
 0x1ef   :  { %3476 = verf.f32 %v1215_v51  ;;  %v1594_v11 = vmul.f32 %v1466_v55, %v1082_v7  ;;  %v1217_v38 = vmul.f32 0.70710677, %v4150_v47  ;;  %v1088_v51 = vmul.f32 0.5, %v4142_v50 }
 0x1f0   :  { %3478 = verf.f32 %v1216_v63  ;;  %v1218_v1 = vmul.f32 0.70710677, %v4153_v0  ;;  %v1683_v21 = vpack.c.bf16 %v1593_v32, %v1591_v9  ;;  %v1089_v59 = vmul.f32 0.5, %v4150_v47 }
 0x1f1   :  { %v3469_v17 = vpop.eup %3468  ;;  %3480 = verf.f32 %v1217_v38  ;;  %v1684_v8 = vpack.c.bf16 %v1594_v11, %v1592_v62  ;;  %v1090_v9 = vmul.f32 0.5, %v4153_v0 }
 0x1f2   :  { %v3471_v25 = vpop.eup %3470  ;;  %v898_v5 = vpop.f32.mrb[84].mxu0  ;;  %v1467_v10 = vadd.f32 1.0, %v3469_v17  ;;  %3482 = verf.f32 %v1218_v1 }
 0x1f3   :  { %v4158_v31 = vadd.f32 %v898_v5, %v3763_v60  ;;  %v900_v14 = vpop.f32.mrb[85].mxu0  ;;  %v3473_v33 = vpop.eup %3472  ;;  %v1468_v34 = vadd.f32 1.0, %v3471_v25  ;;  %2255 = vmatprep.mubr.bf16.mxu1 %v1684_v8 }
 0x1f4   :  { %v4162_v15 = vadd.f32 %v900_v14, %v3767_v61  ;;  %v902_v22 = vpop.f32.mrb[86].mxu0  ;;  %v3475_v35 = vpop.eup %3474  ;;  %v1469_v36 = vadd.f32 1.0, %v3473_v33  ;;  %2256 = vmatmul.mubr.bf16.gmra.mrb[72].mxu1 %v1683_v21  ;;  %v1595_v41 = vmul.f32 %v1467_v10, %v1083_v18 }
 0x1f5   :  { %v1219_v24 = vmul.f32 0.70710677, %v4158_v31  ;;  %v904_v16 = vpop.f32.mrb[87].mxu0  ;;  %v1470_v26 = vadd.f32 1.0, %v3475_v35  ;;  %v4170_v27 = vadd.f32 %v902_v22, %v3763_v60  ;;  %v1596_v20 = vmul.f32 %v1468_v34, %v1084_v19 }
 0x1f6   :  { %v1220_v29 = vmul.f32 0.70710677, %v4162_v15  ;;  %v1597_v23 = vmul.f32 %v1469_v36, %v1085_v13  ;;  %v4173_v12 = vadd.f32 %v904_v16, %v3767_v61  ;;  %v1091_v22 = vmul.f32 0.5, %v4158_v31 }
 0x1f7   :  { %3484 = verf.f32 %v1219_v24  ;;  %v1598_v43 = vmul.f32 %v1470_v26, %v1086_v37  ;;  %v1221_v30 = vmul.f32 0.70710677, %v4170_v27  ;;  %v1092_v24 = vmul.f32 0.5, %v4162_v15 }
 0x1f8   :  { %3486 = verf.f32 %v1220_v29  ;;  %v1222_v28 = vmul.f32 0.70710677, %v4173_v12  ;;  %v1685_v52 = vpack.c.bf16 %v1597_v23, %v1595_v41  ;;  %v1093_v16 = vmul.f32 0.5, %v4170_v27 }
 0x1f9   :  { %v3477_v48 = vpop.eup %3476  ;;  %3488 = verf.f32 %v1221_v30  ;;  %v1686_v40 = vpack.c.bf16 %v1598_v43, %v1596_v20  ;;  %v1094_v41 = vmul.f32 0.5, %v4173_v12 }
 0x1fa   :  { %v3479_v57 = vpop.eup %3478  ;;  %v908_v39 = vpop.f32.mrb[88].mxu0  ;;  %v1471_v42 = vadd.f32 1.0, %v3477_v48  ;;  %3490 = verf.f32 %v1222_v28 }
 0x1fb   :  { %v4178_v2 = vadd.f32 %v908_v39, %v3763_v60  ;;  %v910_v45 = vpop.f32.mrb[89].mxu0  ;;  %v3481_v3 = vpop.eup %3480  ;;  %v1472_v4 = vadd.f32 1.0, %v3479_v57  ;;  %2265 = vmatprep.mubr.bf16.mxu1 %v1686_v40 }
 0x1fc   :  { %v4182_v46 = vadd.f32 %v910_v45, %v3767_v61  ;;  %v912_v53 = vpop.f32.mrb[90].mxu0  ;;  %v3483_v6 = vpop.eup %3482  ;;  %v1473_v7 = vadd.f32 1.0, %v3481_v3  ;;  %2266 = vmatmul.mubr.bf16.gmra.mrb[76].mxu1 %v1685_v52  ;;  %v1599_v11 = vmul.f32 %v1471_v42, %v1087_v49 }
 0x1fd   :  { %v1223_v55 = vmul.f32 0.70710677, %v4178_v2  ;;  %v914_v63 = vpop.f32.mrb[91].mxu0  ;;  %v1474_v32 = vadd.f32 1.0, %v3483_v6  ;;  %v4190_v62 = vadd.f32 %v912_v53, %v3763_v60  ;;  %v1600_v47 = vmul.f32 %v1472_v4, %v1088_v51 }
 0x1fe   :  { %v1224_v44 = vmul.f32 0.70710677, %v4182_v46  ;;  %v1601_v38 = vmul.f32 %v1473_v7, %v1089_v59  ;;  %v4193_v50 = vadd.f32 %v914_v63, %v3767_v61  ;;  %v1095_v53 = vmul.f32 0.5, %v4178_v2 }
 0x1ff   :  { %3492 = verf.f32 %v1223_v55  ;;  %v1602_v17 = vmul.f32 %v1474_v32, %v1090_v9  ;;  %v1225_v1 = vmul.f32 0.70710677, %v4190_v62  ;;  %v1096_v55 = vmul.f32 0.5, %v4182_v46 }
 0x200   :  { %3494 = verf.f32 %v1224_v44  ;;  %v1226_v0 = vmul.f32 0.70710677, %v4193_v50  ;;  %v1687_v25 = vpack.c.bf16 %v1601_v38, %v1599_v11  ;;  %v1097_v63 = vmul.f32 0.5, %v4190_v62 }
 0x201   :  { %v3485_v21 = vpop.eup %3484  ;;  %3496 = verf.f32 %v1225_v1  ;;  %v1688_v10 = vpack.c.bf16 %v1602_v17, %v1600_v47  ;;  %v1098_v11 = vmul.f32 0.5, %v4193_v50 }
 0x202   :  { %v3487_v5 = vpop.eup %3486  ;;  %v918_v8 = vpop.f32.mrb[92].mxu0  ;;  %v1475_v14 = vadd.f32 1.0, %v3485_v21  ;;  %3498 = verf.f32 %v1226_v0 }
 0x203   :  { %v4198_v33 = vadd.f32 %v918_v8, %v3763_v60  ;;  %v920_v18 = vpop.f32.mrb[93].mxu0  ;;  %v3489_v34 = vpop.eup %3488  ;;  %v1476_v35 = vadd.f32 1.0, %v3487_v5  ;;  %2275 = vmatprep.mubr.bf16.mxu1 %v1688_v10 }
 0x204   :  { %v4202_v19 = vadd.f32 %v920_v18, %v3767_v61  ;;  %v922_v13 = vpop.f32.mrb[94].mxu0  ;;  %v3491_v36 = vpop.eup %3490  ;;  %v1477_v37 = vadd.f32 1.0, %v3489_v34  ;;  %2276 = vmatmul.mubr.bf16.gmra.mrb[80].mxu1 %v1687_v25  ;;  %v1603_v43 = vmul.f32 %v1475_v14, %v1091_v22 }
 0x205   :  { %v1227_v26 = vmul.f32 0.70710677, %v4198_v33  ;;  %v924_v29 = vpop.f32.mrb[95].mxu0  ;;  %v1478_v23 = vadd.f32 1.0, %v3491_v36  ;;  %v4210_v20 = vadd.f32 %v922_v13, %v3763_v60  ;;  %v1604_v27 = vmul.f32 %v1476_v35, %v1092_v24 }
 0x206   :  { %v1228_v31 = vmul.f32 0.70710677, %v4202_v19  ;;  %v1605_v30 = vmul.f32 %v1477_v37, %v1093_v16  ;;  %v4213_v15 = vadd.f32 %v924_v29, %v3767_v61  ;;  %v1099_v13 = vmul.f32 0.5, %v4198_v33 }
 0x207   :  { %3500 = verf.f32 %v1227_v26  ;;  %v1606_v48 = vmul.f32 %v1478_v23, %v1094_v41  ;;  %v1229_v28 = vmul.f32 0.70710677, %v4210_v20  ;;  %v1100_v26 = vmul.f32 0.5, %v4202_v19 }
 0x208   :  { %3502 = verf.f32 %v1228_v31  ;;  %v1230_v12 = vmul.f32 0.70710677, %v4213_v15  ;;  %v1689_v57 = vpack.c.bf16 %v1605_v30, %v1603_v43  ;;  %v1101_v29 = vmul.f32 0.5, %v4210_v20 }
 0x209   :  { %v3493_v52 = vpop.eup %3492  ;;  %3504 = verf.f32 %v1229_v28  ;;  %v1690_v42 = vpack.c.bf16 %v1606_v48, %v1604_v27  ;;  %v1102_v43 = vmul.f32 0.5, %v4213_v15 }
 0x20a   :  { %v3495_v39 = vpop.eup %3494  ;;  %v928_v40 = vpop.f32.mrb[96].mxu0  ;;  %v1479_v45 = vadd.f32 1.0, %v3493_v52  ;;  %3506 = verf.f32 %v1230_v12 }
 0x20b   :  { %v4218_v3 = vadd.f32 %v928_v40, %v3763_v60  ;;  %v930_v49 = vpop.f32.mrb[97].mxu0  ;;  %v3497_v4 = vpop.eup %3496  ;;  %v1480_v6 = vadd.f32 1.0, %v3495_v39  ;;  %2285 = vmatprep.mubr.bf16.mxu1 %v1690_v42 }
 0x20c   :  { %v4222_v51 = vadd.f32 %v930_v49, %v3767_v61  ;;  %v932_v59 = vpop.f32.mrb[98].mxu0  ;;  %v3499_v7 = vpop.eup %3498  ;;  %v1481_v9 = vadd.f32 1.0, %v3497_v4  ;;  %2286 = vmatmul.mubr.bf16.gmra.mrb[84].mxu1 %v1689_v57  ;;  %v1607_v17 = vmul.f32 %v1479_v45, %v1095_v53 }
 0x20d   :  { %v1231_v32 = vmul.f32 0.70710677, %v4218_v3  ;;  %v934_v44 = vpop.f32.mrb[99].mxu0  ;;  %v1482_v38 = vadd.f32 1.0, %v3499_v7  ;;  %v4230_v47 = vadd.f32 %v932_v59, %v3763_v60  ;;  %v1608_v62 = vmul.f32 %v1480_v6, %v1096_v55 }
 0x20e   :  { %v1232_v2 = vmul.f32 0.70710677, %v4222_v51  ;;  %v1609_v1 = vmul.f32 %v1481_v9, %v1097_v63  ;;  %v4233_v46 = vadd.f32 %v934_v44, %v3767_v61  ;;  %v1103_v59 = vmul.f32 0.5, %v4218_v3 }
 0x20f   :  { %3508 = verf.f32 %v1231_v32  ;;  %v1610_v21 = vmul.f32 %v1482_v38, %v1098_v11  ;;  %v1233_v0 = vmul.f32 0.70710677, %v4230_v47  ;;  %v1104_v32 = vmul.f32 0.5, %v4222_v51 }
 0x210   :  { %3510 = verf.f32 %v1232_v2  ;;  %v1234_v50 = vmul.f32 0.70710677, %v4233_v46  ;;  %v1691_v5 = vpack.c.bf16 %v1609_v1, %v1607_v17  ;;  %v1105_v44 = vmul.f32 0.5, %v4230_v47 }
 0x211   :  { %v3501_v25 = vpop.eup %3500  ;;  %3512 = verf.f32 %v1233_v0  ;;  %v1692_v14 = vpack.c.bf16 %v1610_v21, %v1608_v62  ;;  %v1106_v17 = vmul.f32 0.5, %v4233_v46 }
 0x212   :  { %v3503_v8 = vpop.eup %3502  ;;  %v938_v10 = vpop.f32.mrb[100].mxu0  ;;  %v1483_v18 = vadd.f32 1.0, %v3501_v25  ;;  %3514 = verf.f32 %v1234_v50 }
 0x213   :  { %v4238_v34 = vadd.f32 %v938_v10, %v3763_v60  ;;  %v940_v22 = vpop.f32.mrb[101].mxu0  ;;  %v3505_v35 = vpop.eup %3504  ;;  %v1484_v36 = vadd.f32 1.0, %v3503_v8  ;;  %2295 = vmatprep.mubr.bf16.mxu1 %v1692_v14 }
 0x214   :  { %v4242_v24 = vadd.f32 %v940_v22, %v3767_v61  ;;  %v942_v16 = vpop.f32.mrb[102].mxu0  ;;  %v3507_v37 = vpop.eup %3506  ;;  %v1485_v41 = vadd.f32 1.0, %v3505_v35  ;;  %2296 = vmatmul.mubr.bf16.gmra.mrb[88].mxu1 %v1691_v5  ;;  %v1611_v48 = vmul.f32 %v1483_v18, %v1099_v13 }
 0x215   :  { %v1235_v23 = vmul.f32 0.70710677, %v4238_v34  ;;  %v944_v31 = vpop.f32.mrb[103].mxu0  ;;  %v1486_v30 = vadd.f32 1.0, %v3507_v37  ;;  %v4250_v27 = vadd.f32 %v942_v16, %v3763_v60  ;;  %v1612_v20 = vmul.f32 %v1484_v36, %v1100_v26 }
 0x216   :  { %v1236_v33 = vmul.f32 0.70710677, %v4242_v24  ;;  %v1613_v28 = vmul.f32 %v1485_v41, %v1101_v29  ;;  %v4253_v19 = vadd.f32 %v944_v31, %v3767_v61  ;;  %v1107_v16 = vmul.f32 0.5, %v4238_v34 }
 0x217   :  { %3516 = verf.f32 %v1235_v23  ;;  %v1614_v52 = vmul.f32 %v1486_v30, %v1102_v43  ;;  %v1237_v12 = vmul.f32 0.70710677, %v4250_v27  ;;  %v1108_v23 = vmul.f32 0.5, %v4242_v24 }
 0x218   :  { %3518 = verf.f32 %v1236_v33  ;;  %v1238_v15 = vmul.f32 0.70710677, %v4253_v19  ;;  %v1693_v39 = vpack.c.bf16 %v1613_v28, %v1611_v48  ;;  %v1109_v31 = vmul.f32 0.5, %v4250_v27 }
 0x219   :  { %v3509_v57 = vpop.eup %3508  ;;  %3520 = verf.f32 %v1237_v12  ;;  %v1694_v45 = vpack.c.bf16 %v1614_v52, %v1612_v20  ;;  %v1110_v48 = vmul.f32 0.5, %v4253_v19 }
 0x21a   :  { %v3511_v40 = vpop.eup %3510  ;;  %v948_v42 = vpop.f32.mrb[104].mxu0  ;;  %v1487_v49 = vadd.f32 1.0, %v3509_v57  ;;  %3522 = verf.f32 %v1238_v15 }
 0x21b   :  { %v4258_v4 = vadd.f32 %v948_v42, %v3763_v60  ;;  %v950_v53 = vpop.f32.mrb[105].mxu0  ;;  %v3513_v6 = vpop.eup %3512  ;;  %v1488_v7 = vadd.f32 1.0, %v3511_v40  ;;  %2305 = vmatprep.mubr.bf16.mxu1 %v1694_v45 }
 0x21c   :  { %v4262_v55 = vadd.f32 %v950_v53, %v3767_v61  ;;  %v952_v63 = vpop.f32.mrb[106].mxu0  ;;  %v3515_v9 = vpop.eup %3514  ;;  %v1489_v11 = vadd.f32 1.0, %v3513_v6  ;;  %2306 = vmatmul.mubr.bf16.gmra.mrb[92].mxu1 %v1693_v39  ;;  %v1615_v21 = vmul.f32 %v1487_v49, %v1103_v59 }
 0x21d   :  { %v1239_v38 = vmul.f32 0.70710677, %v4258_v4  ;;  %v954_v2 = vpop.f32.mrb[107].mxu0  ;;  %v1490_v1 = vadd.f32 1.0, %v3515_v9  ;;  %v4270_v62 = vadd.f32 %v952_v63, %v3763_v60  ;;  %v1616_v47 = vmul.f32 %v1488_v7, %v1104_v32 }
 0x21e   :  { %v1240_v3 = vmul.f32 0.70710677, %v4262_v55  ;;  %v1617_v0 = vmul.f32 %v1489_v11, %v1105_v44  ;;  %v4273_v51 = vadd.f32 %v954_v2, %v3767_v61  ;;  %v1111_v63 = vmul.f32 0.5, %v4258_v4 }
 0x21f   :  { %3524 = verf.f32 %v1239_v38  ;;  %v1618_v25 = vmul.f32 %v1490_v1, %v1106_v17  ;;  %v1241_v50 = vmul.f32 0.70710677, %v4270_v62  ;;  %v1112_v38 = vmul.f32 0.5, %v4262_v55 }
 0x220   :  { %3526 = verf.f32 %v1240_v3  ;;  %v1242_v46 = vmul.f32 0.70710677, %v4273_v51  ;;  %v1695_v8 = vpack.c.bf16 %v1617_v0, %v1615_v21  ;;  %v1113_v2 = vmul.f32 0.5, %v4270_v62 }
 0x221   :  { %v3517_v5 = vpop.eup %3516  ;;  %3528 = verf.f32 %v1241_v50  ;;  %v1696_v18 = vpack.c.bf16 %v1618_v25, %v1616_v47  ;;  %v1114_v21 = vmul.f32 0.5, %v4273_v51  ;;  %v1871_v51 = vld [vmem:[%s4543_s4] sm:$0x3]  ;;  %s3671_s4 = smov [#allocation9]  }
 0x222   :  { %v3519_v10 = vpop.eup %3518  ;;  %v958_v14 = vpop.f32.mrb[108].mxu0  ;;  %v1491_v22 = vadd.f32 1.0, %v3517_v5  ;;  %3530 = verf.f32 %v1242_v46  ;;  %s2849_s8 = sshll.u32 %s3671_s4, 4  ;;  %s2850_s8 = int_to_ptr.vmem [resolvable:$true] %s2849_s8 }
 0x223   :  { %v4278_v35 = vadd.f32 %v958_v14, %v3763_v60  ;;  %v960_v13 = vpop.f32.mrb[109].mxu0  ;;  %v3521_v36 = vpop.eup %3520  ;;  %v1492_v37 = vadd.f32 1.0, %v3519_v10  ;;  %2315 = vmatprep.mubr.bf16.mxu1 %v1696_v18  ;;  %s3638_s9 = scalar_lea.vmem %s2850_s8, 8192  ;;  %p3643_p11 = scmp.lt.s32.totalorder %s2850_s8, %s2850_s8 }
 0x224   :  { %v4282_v26 = vadd.f32 %v960_v13, %v3767_v61  ;;  %v962_v29 = vpop.f32.mrb[110].mxu0  ;;  %v3523_v41 = vpop.eup %3522  ;;  %v1493_v43 = vadd.f32 1.0, %v3521_v36  ;;  %2316 = vmatmul.mubr.bf16.gmra.mrb[96].mxu1 %v1695_v8  ;;  %v1619_v52 = vmul.f32 %v1491_v22, %v1107_v16  ;;  %p3639_p10 = scmp.ne.s32.totalorder %s2850_s8, %s3638_s9  ;;  %p3644_p12 = scmp.lt.s32.totalorder %s3638_s9, %s3638_s9 }
 0x225   :  { %v1243_v30 = vmul.f32 0.70710677, %v4278_v35  ;;  %v964_v33 = vpop.f32.mrb[111].mxu0  ;;  %v1494_v28 = vadd.f32 1.0, %v3523_v41  ;;  %v4290_v20 = vadd.f32 %v962_v29, %v3763_v60  ;;  %v1620_v27 = vmul.f32 %v1492_v37, %v1108_v23 }
 0x226   :  { %v1244_v34 = vmul.f32 0.70710677, %v4282_v26  ;;  %v1621_v12 = vmul.f32 %v1493_v43, %v1109_v31  ;;  %v4293_v24 = vadd.f32 %v964_v33, %v3767_v61  ;;  %v4325_v29 = vrot.slane %v1871_v51, %v166_v56  ;;  %p3645_p13 = por %p3644_p12, %p3643_p11 }
 0x227   :  { %3532 = verf.f32 %v1243_v30  ;;  %v1622_v57 = vmul.f32 %v1494_v28, %v1110_v48  ;;  %v1245_v15 = vmul.f32 0.70710677, %v4290_v20  ;;  %v1115_v23 = vmul.f32 0.5, %v4278_v35 }
 0x228   :  { %3534 = verf.f32 %v1244_v34  ;;  %v1246_v19 = vmul.f32 0.70710677, %v4293_v24  ;;  %v1697_v40 = vpack.c.bf16 %v1621_v12, %v1619_v52  ;;  %v4333_v33 = vrot.slane %v1871_v51, %v170_v58  ;;  %p3646_p0 = pnand %p3645_p13, %p3639_p10 }
 0x229   :  { %v3525_v39 = vpop.eup %3524  ;;  %3536 = verf.f32 %v1245_v15  ;;  %v1698_v49 = vpack.c.bf16 %v1622_v57, %v1620_v27  ;;  %v1116_v28 = vmul.f32 0.5, %v4282_v26  ;;  %v1117_v34 = vmul.f32 0.5, %v4290_v20 }
 0x22a   :  { %v3527_v42 = vpop.eup %3526  ;;  %v968_v45 = vpop.f32.mrb[112].mxu0  ;;  %v1495_v53 = vadd.f32 1.0, %v3525_v39  ;;  %3538 = verf.f32 %v1246_v19  ;;  %v1118_v12 = vmul.f32 0.5, %v4293_v24 }
 0x22b   :  { %v4298_v6 = vadd.f32 %v968_v45, %v3763_v60  ;;  %v970_v59 = vpop.f32.mrb[113].mxu0  ;;  %v3529_v7 = vpop.eup %3528  ;;  %v1496_v9 = vadd.f32 1.0, %v3527_v42  ;;  %2325 = vmatprep.mubr.bf16.mxu1 %v1698_v49 }
 0x22c   :  { %v4302_v32 = vadd.f32 %v970_v59, %v3767_v61  ;;  %v972_v44 = vpop.f32.mrb[114].mxu0  ;;  %v3531_v11 = vpop.eup %3530  ;;  %v1497_v17 = vadd.f32 1.0, %v3529_v7  ;;  %2326 = vmatmul.mubr.bf16.gmra.mrb[100].mxu1 %v1697_v40  ;;  %v1623_v25 = vmul.f32 %v1495_v53, %v1111_v63 }
 0x22d   :  { %v1247_v1 = vmul.f32 0.70710677, %v4298_v6  ;;  %v974_v3 = vpop.f32.mrb[115].mxu0  ;;  %v1498_v0 = vadd.f32 1.0, %v3531_v11  ;;  %v4310_v47 = vadd.f32 %v972_v44, %v3763_v60  ;;  %v1624_v62 = vmul.f32 %v1496_v9, %v1112_v38 }
 0x22e   :  { %v1248_v4 = vmul.f32 0.70710677, %v4302_v32  ;;  %v1625_v50 = vmul.f32 %v1497_v17, %v1113_v2  ;;  %v4313_v55 = vadd.f32 %v974_v3, %v3767_v61  ;;  %v1119_v7 = vmul.f32 0.5, %v4298_v6 }
 0x22f   :  { %3540 = verf.f32 %v1247_v1  ;;  %v1626_v5 = vmul.f32 %v1498_v0, %v1114_v21  ;;  %v1249_v46 = vmul.f32 0.70710677, %v4310_v47 }
 0x230   :  { %3542 = verf.f32 %v1248_v4  ;;  %v1250_v10 = vmul.f32 0.70710677, %v4313_v55  ;;  %v1699_v14 = vpack.c.bf16 %v1625_v50, %v1623_v25 }
 0x231   :  { %v3533_v8 = vpop.eup %3532  ;;  %3544 = verf.f32 %v1249_v46  ;;  %v1700_v13 = vpack.c.bf16 %v1626_v5, %v1624_v62  ;;  %v1120_v5 = vmul.f32 0.5, %v4302_v32  ;;  %v1121_v46 = vmul.f32 0.5, %v4310_v47 }
 0x232   :  { %v3535_v18 = vpop.eup %3534  ;;  %v978_v22 = vpop.f32.mrb[116].mxu0  ;;  %v1499_v36 = vadd.f32 1.0, %v3533_v8  ;;  %3546 = verf.f32 %v1250_v10 }
 0x233   :  { %v4321_v16 = vadd.f32 %v978_v22, %v3763_v60  ;;  %v980_v37 = vpop.f32.mrb[117].mxu0  ;;  %v3537_v41 = vpop.eup %3536  ;;  %v1500_v31 = vadd.f32 1.0, %v3535_v18  ;;  %2335 = vmatprep.mubr.bf16.mxu1 %v1700_v13 }
 0x234   :  { %v4329_v43 = vadd.f32 %v980_v37, %v3767_v61  ;;  %v982_v30 = vpop.f32.mrb[118].mxu0  ;;  %v3539_v48 = vpop.eup %3538  ;;  %v1501_v56 = vadd.f32 1.0, %v3537_v41  ;;  %2336 = vmatmul.mubr.bf16.gmra.mrb[104].mxu1 %v1699_v14  ;;  %v1627_v54 = vmul.f32 %v1499_v36, %v1115_v23  ;;  %v1122_v14 = vmul.f32 0.5, %v4313_v55 }
 0x235   :  { %v1251_v52 = vmul.f32 0.70710677, %v4321_v16  ;;  %v984_v35 = vpop.f32.mrb[119].mxu0  ;;  %v1502_v27 = vadd.f32 1.0, %v3539_v48  ;;  %v4341_v15 = vadd.f32 %v982_v30, %v3763_v60  ;;  %v1628_v26 = vmul.f32 %v1500_v31, %v1116_v28 }
 0x236   :  { %v1252_v57 = vmul.f32 0.70710677, %v4329_v43  ;;  %v1629_v58 = vmul.f32 %v1501_v56, %v1117_v34  ;;  %v4344_v39 = vadd.f32 %v984_v35, %v3767_v61 }
 0x237   :  { %v1630_v20 = vmul.f32 %v1502_v27, %v1118_v12  ;;  %v1253_v19 = vmul.f32 0.70710677, %v4341_v15  ;;  %v2077_v40 = vpop.f32.mrb[0].mxu1 }
 0x238   :  { %3548 = verf.f32 %v1252_v57  ;;  %v1254_v24 = vmul.f32 0.70710677, %v4344_v39  ;;  %v2078_v45 = vadd.f32 %v2077_v40, %v4325_v29  ;;  %v2079_v49 = vpop.f32.mrb[1].mxu1  ;;  %v1701_v53 = vpack.c.bf16 %v1629_v58, %v1627_v54 }
 0x239   :  { %v3541_v42 = vpop.eup %3540  ;;  %3550 = verf.f32 %v1251_v52  ;;  %v2080_v63 = vadd.f32 %v2079_v49, %v4333_v33  ;;  %v2081_v9 = vpop.f32.mrb[2].mxu1  ;;  %v1702_v11 = vpack.c.bf16 %v1630_v20, %v1628_v26  ;;  %v1124_v20 = vmul.f32 0.5, %v4329_v43 }
 0x23a   :  { %v3543_v59 = vpop.eup %3542  ;;  %3552 = verf.f32 %v1253_v19  ;;  %v988_v44 = vpop.f32.mrb[120].mxu0  ;;  %v1503_v38 = vadd.f32 1.0, %v3541_v42  ;;  %v2082_v2 = vadd.f32 %v2081_v9, %v4325_v29  ;;  %v1126_v9 = vmul.f32 0.5, %v4344_v39 }
 0x23b   :  { %3554 = verf.f32 %v1254_v24  ;;  %v4353_v17 = vadd.f32 %v988_v44, %v3763_v60  ;;  %v2083_v1 = vpop.f32.mrb[3].mxu1  ;;  %v990_v3 = vpop.f32.mrb[121].mxu0  ;;  %v1504_v0 = vadd.f32 1.0, %v3543_v59  ;;  %v3054_v4 = vpack.c.bf16 %v2080_v63, %v2078_v45  ;;  %2345 = vmatprep.mubr.bf16.mxu1 %v1702_v11 }
 0x23c   :  { %v3545_v21 = vpop.eup %3544  ;;  %v2084_v6 = vadd.f32 %v2083_v1, %v4333_v33  ;;  %v4357_v25 = vadd.f32 %v990_v3, %v3767_v61  ;;  %v992_v50 = vpop.f32.mrb[122].mxu0  ;;  %2346 = vmatmul.mubr.bf16.gmra.mrb[108].mxu1 %v1701_v53  ;;  %v1631_v47 = vmul.f32 %v1503_v38, %v1119_v7  ;;  %v1125_v53 = vmul.f32 0.5, %v4341_v15 }
 0x23d   :  { %v3547_v62 = vpop.eup %3546  ;;  %v1505_v51 = vadd.f32 1.0, %v3545_v21  ;;  %v1255_v8 = vmul.f32 0.70710677, %v4353_v17  ;;  %v994_v10 = vpop.f32.mrb[123].mxu0  ;;  %2780 = vst [vmem:[#allocation9] sm:$0xff] %v3054_v4  ;;  %v4365_v37 = vadd.f32 %v992_v50, %v3763_v60  ;;  %v1632_v41 = vmul.f32 %v1504_v0, %v1120_v5 }
 0x23e   :  { %v1506_v18 = vadd.f32 1.0, %v3547_v62  ;;  %v3055_v22 = vpack.c.bf16 %v2084_v6, %v2082_v2  ;;  %v1256_v13 = vmul.f32 0.70710677, %v4357_v25  ;;  %v4368_v32 = vadd.f32 %v994_v10, %v3767_v61 }
 0x23f   :  { %v1633_v36 = vmul.f32 %v1505_v51, %v1121_v46  ;;  %3556 = verf.f32 %v1255_v8  ;;  %v2087_v31 = vpop.f32.mrb[4].mxu1  ;;  %v1257_v55 = vmul.f32 0.70710677, %v4365_v37  ;;  %v1123_v3 = vmul.f32 0.5, %v4321_v16 }
 0x240   :  { %v1634_v23 = vmul.f32 %v1506_v18, %v1122_v14  ;;  %2781 = vst [vmem:[#allocation9 + $0x8] sm:$0xff] %v3055_v22  ;;  %3558 = verf.f32 %v1256_v13  ;;  %v1258_v30 = vmul.f32 0.70710677, %v4368_v32  ;;  %v2088_v28 = vadd.f32 %v2087_v31, %v4325_v29  ;;  %v2089_v34 = vpop.f32.mrb[5].mxu1 }
 0x241   :  { %v1703_v35 = vpack.c.bf16 %v1633_v36, %v1631_v47  ;;  %3560 = verf.f32 %v1257_v55  ;;  %v2090_v27 = vadd.f32 %v2089_v34, %v4333_v33  ;;  %v2091_v57 = vpop.f32.mrb[6].mxu1  ;;  %v1127_v55 = vmul.f32 0.5, %v4353_v17 }
 0x242   :  { %v3549_v48 = vpop.eup %3548  ;;  %v998_v56 = vpop.f32.mrb[124].mxu0  ;;  %v1704_v52 = vpack.c.bf16 %v1634_v23, %v1632_v41  ;;  %3562 = verf.f32 %v1258_v30  ;;  %v2092_v19 = vadd.f32 %v2091_v57, %v4325_v29  ;;  %v1129_v30 = vmul.f32 0.5, %v4365_v37 }
 0x243   :  { %v3551_v12 = vpop.eup %3550  ;;  %v4375_v54 = vadd.f32 %v998_v56, %v3763_v60  ;;  %v1000_v58 = vpop.f32.mrb[125].mxu0  ;;  %v1508_v49 = vadd.f32 1.0, %v3549_v48  ;;  %v3056_v7 = vpack.c.bf16 %v2090_v27, %v2088_v28  ;;  %v1128_v34 = vmul.f32 0.5, %v4357_v25 }
 0x244   :  { %v3553_v26 = vpop.eup %3552  ;;  %v2093_v40 = vpop.f32.mrb[7].mxu1  ;;  %v4380_v42 = vadd.f32 %v1000_v58, %v3767_v61  ;;  %2355 = vmatprep.mubr.bf16.mxu1 %v1704_v52  ;;  %v1507_v38 = vadd.f32 1.0, %v3551_v12  ;;  %v1130_v56 = vmul.f32 0.5, %v4368_v32 }
 0x245   :  { %v1002_v24 = vpop.f32.mrb[126].mxu0  ;;  %v3555_v45 = vpop.eup %3554  ;;  %v1509_v59 = vadd.f32 1.0, %v3553_v26  ;;  %2356 = vmatmul.mubr.bf16.gmra.mrb[112].mxu1 %v1703_v35  ;;  %v1259_v44 = vmul.f32 0.70710677, %v4375_v54  ;;  %v2094_v11 = vadd.f32 %v2093_v40, %v4333_v33  ;;  %2782 = vst [vmem:[#allocation9 + $0x10] sm:$0xff] %v3056_v7  ;;  %v1636_v6 = vmul.f32 %v1508_v49, %v1124_v20 }
 0x246   :  { %v1004_v63 = vpop.f32.mrb[127].mxu0  ;;  %v1510_v43 = vadd.f32 1.0, %v3555_v45  ;;  %v1260_v2 = vmul.f32 0.70710677, %v4380_v42  ;;  %v4388_v1 = vadd.f32 %v1002_v24, %v3763_v60  ;;  %v1635_v8 = vmul.f32 %v1507_v38, %v1123_v3 }
 0x247   :  { %v4391_v15 = vadd.f32 %v1004_v63, %v3767_v61  ;;  %3564 = verf.f32 %v1259_v44  ;;  %v3057_v39 = vpack.c.bf16 %v2094_v11, %v2092_v19  ;;  %v2097_v0 = vpop.f32.mrb[8].mxu1  ;;  %v1637_v50 = vmul.f32 %v1509_v59, %v1125_v53 }
 0x248   :  { %v1638_v21 = vmul.f32 %v1510_v43, %v1126_v9  ;;  %3566 = verf.f32 %v1260_v2  ;;  %v1261_v62 = vmul.f32 0.70710677, %v4388_v1  ;;  %v2099_v5 = vpop.f32.mrb[9].mxu1  ;;  %v2098_v61 = vadd.f32 %v2097_v0, %v4325_v29 }
 0x249   :  { %v3557_v4 = vpop.eup %3556  ;;  %2783 = vst [vmem:[#allocation9 + $0x18] sm:$0xff] %v3057_v39  ;;  %v1262_v60 = vmul.f32 0.70710677, %v4391_v15  ;;  %v2100_v51 = vadd.f32 %v2099_v5, %v4333_v33  ;;  %v2101_v16 = vpop.f32.mrb[10].mxu1  ;;  %v1705_v23 = vpack.c.bf16 %v1637_v50, %v1635_v8  ;;  %v1131_v43 = vmul.f32 0.5, %v4375_v54 }
 0x24a   :  { %v3559_v46 = vpop.eup %3558  ;;  %3568 = verf.f32 %v1261_v62  ;;  %v2102_v10 = vadd.f32 %v2101_v16, %v4325_v29  ;;  %v2103_v14 = vpop.f32.mrb[11].mxu1  ;;  %v1706_v18 = vpack.c.bf16 %v1638_v21, %v1636_v6  ;;  %v1511_v22 = vadd.f32 1.0, %v3557_v4 }
 0x24b   :  { %3570 = verf.f32 %v1262_v60  ;;  %v3058_v13 = vpack.c.bf16 %v2100_v51, %v2098_v61  ;;  %v2104_v36 = vadd.f32 %v2103_v14, %v4333_v33  ;;  %v3561_v47 = vpop.eup %3560  ;;  %v1512_v41 = vadd.f32 1.0, %v3559_v46 }
 0x24c   :  { %2365 = vmatprep.mubr.bf16.mxu1 %v1706_v18  ;;  %v3563_v31 = vpop.eup %3562  ;;  %v1513_v48 = vadd.f32 1.0, %v3561_v47  ;;  %v1639_v35 = vmul.f32 %v1511_v22, %v1127_v55  ;;  %v1133_v44 = vmul.f32 0.5, %v4388_v1  ;;  %v1132_v2 = vmul.f32 0.5, %v4380_v42 }
 0x24d   :  { %2784 = vst [vmem:[#allocation9 + $0x20] sm:$0xff] %v3058_v13  ;;  %v3059_v28 = vpack.c.bf16 %v2104_v36, %v2102_v10  ;;  %v1514_v52 = vadd.f32 1.0, %v3563_v31  ;;  %2366 = vmatmul.mubr.bf16.gmra.mrb[116].mxu1 %v1705_v23  ;;  %v1640_v57 = vmul.f32 %v1512_v41, %v1128_v34  ;;  %v1134_v3 = vmul.f32 0.5, %v4391_v15 }
 0x24e   :  { %v1641_v12 = vmul.f32 %v1513_v48, %v1129_v30 }
 0x24f   :  { %2785 = vst [vmem:[#allocation9 + $0x28] sm:$0xff] %v3059_v28  ;;  %v2107_v27 = vpop.f32.mrb[12].mxu1  ;;  %v1642_v58 = vmul.f32 %v1514_v52, %v1130_v56 }
 0x250   :  { %v2108_v26 = vadd.f32 %v2107_v27, %v4325_v29  ;;  %v2109_v17 = vpop.f32.mrb[13].mxu1  ;;  %v1707_v40 = vpack.c.bf16 %v1641_v12, %v1639_v35 }
 0x251   :  { %v3565_v20 = vpop.eup %3564  ;;  %v2110_v37 = vadd.f32 %v2109_v17, %v4333_v33  ;;  %v2111_v19 = vpop.f32.mrb[14].mxu1  ;;  %v1708_v45 = vpack.c.bf16 %v1642_v58, %v1640_v57 }
 0x252   :  { %v3567_v24 = vpop.eup %3566  ;;  %v2112_v25 = vadd.f32 %v2111_v19, %v4325_v29  ;;  %v2113_v32 = vpop.f32.mrb[15].mxu1  ;;  %v1515_v49 = vadd.f32 1.0, %v3565_v20 }
 0x253   :  { %v3060_v53 = vpack.c.bf16 %v2110_v37, %v2108_v26  ;;  %v2114_v59 = vadd.f32 %v2113_v32, %v4333_v33  ;;  %v1516_v63 = vadd.f32 1.0, %v3567_v24  ;;  %2375 = vmatprep.mubr.bf16.mxu1 %v1708_v45 }
 0x254   :  { %v3569_v7 = vpop.eup %3568  ;;  %v1643_v39 = vmul.f32 %v1515_v49, %v1131_v43 }
 0x255   :  { %v3571_v9 = vpop.eup %3570  ;;  %v1517_v11 = vadd.f32 1.0, %v3569_v7  ;;  %2786 = vst [vmem:[#allocation9 + $0x30] sm:$0xff] %v3060_v53  ;;  %v3061_v38 = vpack.c.bf16 %v2114_v59, %v2112_v25  ;;  %2376 = vmatmul.mubr.bf16.gmra.mrb[120].mxu1 %v1707_v40  ;;  %v1644_v6 = vmul.f32 %v1516_v63, %v1132_v2 }
 0x256   :  { %v1518_v21 = vadd.f32 1.0, %v3571_v9 }
 0x257   :  { %v1645_v0 = vmul.f32 %v1517_v11, %v1133_v44  ;;  %2787 = vst [vmem:[#allocation9 + $0x38] sm:$0xff] %v3061_v38  ;;  %v2117_v4 = vpop.f32.mrb[16].mxu1 }
 0x258   :  { %v1646_v50 = vmul.f32 %v1518_v21, %v1134_v3  ;;  %v2118_v62 = vadd.f32 %v2117_v4, %v4325_v29  ;;  %v2119_v54 = vpop.f32.mrb[17].mxu1 }
 0x259   :  { %v2120_v1 = vadd.f32 %v2119_v54, %v4333_v33  ;;  %v2121_v5 = vpop.f32.mrb[18].mxu1  ;;  %v1709_v46 = vpack.c.bf16 %v1645_v0, %v1643_v39 }
 0x25a   :  { %v2122_v60 = vadd.f32 %v2121_v5, %v4325_v29  ;;  %v2123_v42 = vpop.f32.mrb[19].mxu1  ;;  %v1710_v61 = vpack.c.bf16 %v1646_v50, %v1644_v6 }
 0x25b   :  { %v3062_v15 = vpack.c.bf16 %v2120_v1, %v2118_v62  ;;  %v2124_v51 = vadd.f32 %v2123_v42, %v4333_v33 }
 0x25c   :  { %2385 = vmatprep.mubr.bf16.mxu1 %v1710_v61 }
 0x25d   :  { %2788 = vst [vmem:[#allocation9 + $0x40] sm:$0xff] %v3062_v15  ;;  %v3063_v16 = vpack.c.bf16 %v2124_v51, %v2122_v60  ;;  %2386 = vmatmul.mubr.bf16.gmra.mrb[124].mxu1 %v1709_v46 }
 0x25f   :  { %2789 = vst [vmem:[#allocation9 + $0x48] sm:$0xff] %v3063_v16  ;;  %v2127_v8 = vpop.f32.mrb[20].mxu1 }
 0x260   :  { %v2128_v10 = vadd.f32 %v2127_v8, %v4325_v29  ;;  %v2129_v14 = vpop.f32.mrb[21].mxu1 }
 0x261   :  { %v2130_v18 = vadd.f32 %v2129_v14, %v4333_v33  ;;  %v2131_v22 = vpop.f32.mrb[22].mxu1 }
 0x262   :  { %v2132_v13 = vadd.f32 %v2131_v22, %v4325_v29  ;;  %v2133_v36 = vpop.f32.mrb[23].mxu1 }
 0x263   :  { %v3064_v47 = vpack.c.bf16 %v2130_v18, %v2128_v10  ;;  %v2134_v41 = vadd.f32 %v2133_v36, %v4333_v33 }
 0x265   :  { %2790 = vst [vmem:[#allocation9 + $0x50] sm:$0xff] %v3064_v47  ;;  %v3065_v23 = vpack.c.bf16 %v2134_v41, %v2132_v13 }
 0x267   :  { %2791 = vst [vmem:[#allocation9 + $0x58] sm:$0xff] %v3065_v23  ;;  %v2137_v31 = vpop.f32.mrb[24].mxu1 }
 0x268   :  { %v2138_v55 = vadd.f32 %v2137_v31, %v4325_v29  ;;  %v2139_v30 = vpop.f32.mrb[25].mxu1 }
 0x269   :  { %v2140_v48 = vadd.f32 %v2139_v30, %v4333_v33  ;;  %v2141_v28 = vpop.f32.mrb[26].mxu1 }
 0x26a   :  { %v2142_v34 = vadd.f32 %v2141_v28, %v4325_v29  ;;  %v2143_v56 = vpop.f32.mrb[27].mxu1 }
 0x26b   :  { %v3066_v52 = vpack.c.bf16 %v2140_v48, %v2138_v55  ;;  %v2144_v35 = vadd.f32 %v2143_v56, %v4333_v33 }
 0x26d   :  { %2792 = vst [vmem:[#allocation9 + $0x60] sm:$0xff] %v3066_v52  ;;  %v3067_v12 = vpack.c.bf16 %v2144_v35, %v2142_v34 }
 0x26f   :  { %2793 = vst [vmem:[#allocation9 + $0x68] sm:$0xff] %v3067_v12  ;;  %v2147_v27 = vpop.f32.mrb[28].mxu1 }
 0x270   :  { %v2148_v57 = vadd.f32 %v2147_v27, %v4325_v29  ;;  %v2149_v58 = vpop.f32.mrb[29].mxu1 }
 0x271   :  { %v2150_v26 = vadd.f32 %v2149_v58, %v4333_v33  ;;  %v2151_v17 = vpop.f32.mrb[30].mxu1 }
 0x272   :  { %v2152_v20 = vadd.f32 %v2151_v17, %v4325_v29  ;;  %v2153_v37 = vpop.f32.mrb[31].mxu1 }
 0x273   :  { %v3068_v19 = vpack.c.bf16 %v2150_v26, %v2148_v57  ;;  %v2154_v40 = vadd.f32 %v2153_v37, %v4333_v33 }
 0x275   :  { %2794 = vst [vmem:[#allocation9 + $0x70] sm:$0xff] %v3068_v19  ;;  %v3069_v24 = vpack.c.bf16 %v2154_v40, %v2152_v20 }
 0x277   :  { %2795 = vst [vmem:[#allocation9 + $0x78] sm:$0xff] %v3069_v24  ;;  %v2157_v25 = vpop.f32.mrb[32].mxu1 }
 0x278   :  { %v2158_v32 = vadd.f32 %v2157_v25, %v4325_v29  ;;  %v2159_v45 = vpop.f32.mrb[33].mxu1 }
 0x279   :  { %v2160_v49 = vadd.f32 %v2159_v45, %v4333_v33  ;;  %v2161_v53 = vpop.f32.mrb[34].mxu1 }
 0x27a   :  { %v2162_v59 = vadd.f32 %v2161_v53, %v4325_v29  ;;  %v2163_v7 = vpop.f32.mrb[35].mxu1 }
 0x27b   :  { %v3070_v63 = vpack.c.bf16 %v2160_v49, %v2158_v32  ;;  %v2164_v9 = vadd.f32 %v2163_v7, %v4333_v33 }
 0x27d   :  { %2796 = vst [vmem:[#allocation9 + $0x80] sm:$0xff] %v3070_v63  ;;  %v3071_v43 = vpack.c.bf16 %v2164_v9, %v2162_v59 }
 0x27f   :  { %2797 = vst [vmem:[#allocation9 + $0x88] sm:$0xff] %v3071_v43  ;;  %v2167_v44 = vpop.f32.mrb[36].mxu1 }
 0x280   :  { %v2168_v11 = vadd.f32 %v2167_v44, %v4325_v29  ;;  %v2169_v38 = vpop.f32.mrb[37].mxu1 }
 0x281   :  { %v2170_v2 = vadd.f32 %v2169_v38, %v4333_v33  ;;  %v2171_v3 = vpop.f32.mrb[38].mxu1 }
 0x282   :  { %v2172_v21 = vadd.f32 %v2171_v3, %v4325_v29  ;;  %v2173_v39 = vpop.f32.mrb[39].mxu1 }
 0x283   :  { %v3072_v0 = vpack.c.bf16 %v2170_v2, %v2168_v11  ;;  %v2174_v4 = vadd.f32 %v2173_v39, %v4333_v33 }
 0x285   :  { %2798 = vst [vmem:[#allocation9 + $0x90] sm:$0xff] %v3072_v0  ;;  %v3073_v6 = vpack.c.bf16 %v2174_v4, %v2172_v21 }
 0x287   :  { %2799 = vst [vmem:[#allocation9 + $0x98] sm:$0xff] %v3073_v6  ;;  %v2177_v50 = vpop.f32.mrb[40].mxu1 }
 0x288   :  { %v2178_v62 = vadd.f32 %v2177_v50, %v4325_v29  ;;  %v2179_v54 = vpop.f32.mrb[41].mxu1 }
 0x289   :  { %v2180_v1 = vadd.f32 %v2179_v54, %v4333_v33  ;;  %v2181_v5 = vpop.f32.mrb[42].mxu1 }
 0x28a   :  { %v2182_v46 = vadd.f32 %v2181_v5, %v4325_v29  ;;  %v2183_v60 = vpop.f32.mrb[43].mxu1 }
 0x28b   :  { %v3074_v42 = vpack.c.bf16 %v2180_v1, %v2178_v62  ;;  %v2184_v61 = vadd.f32 %v2183_v60, %v4333_v33 }
 0x28d   :  { %2800 = vst [vmem:[#allocation9 + $0xa0] sm:$0xff] %v3074_v42  ;;  %v3075_v15 = vpack.c.bf16 %v2184_v61, %v2182_v46 }
 0x28f   :  { %2801 = vst [vmem:[#allocation9 + $0xa8] sm:$0xff] %v3075_v15  ;;  %v2187_v51 = vpop.f32.mrb[44].mxu1 }
 0x290   :  { %v2188_v16 = vadd.f32 %v2187_v51, %v4325_v29  ;;  %v2189_v8 = vpop.f32.mrb[45].mxu1 }
 0x291   :  { %v2190_v10 = vadd.f32 %v2189_v8, %v4333_v33  ;;  %v2191_v14 = vpop.f32.mrb[46].mxu1 }
 0x292   :  { %v2192_v18 = vadd.f32 %v2191_v14, %v4325_v29  ;;  %v2193_v22 = vpop.f32.mrb[47].mxu1 }
 0x293   :  { %v3076_v13 = vpack.c.bf16 %v2190_v10, %v2188_v16  ;;  %v2194_v36 = vadd.f32 %v2193_v22, %v4333_v33 }
 0x295   :  { %2802 = vst [vmem:[#allocation9 + $0xb0] sm:$0xff] %v3076_v13  ;;  %v3077_v47 = vpack.c.bf16 %v2194_v36, %v2192_v18 }
 0x297   :  { %2803 = vst [vmem:[#allocation9 + $0xb8] sm:$0xff] %v3077_v47  ;;  %v2197_v41 = vpop.f32.mrb[48].mxu1 }
 0x298   :  { %v2198_v23 = vadd.f32 %v2197_v41, %v4325_v29  ;;  %v2199_v31 = vpop.f32.mrb[49].mxu1 }
 0x299   :  { %v2200_v55 = vadd.f32 %v2199_v31, %v4333_v33  ;;  %v2201_v30 = vpop.f32.mrb[50].mxu1 }
 0x29a   :  { %v2202_v48 = vadd.f32 %v2201_v30, %v4325_v29  ;;  %v2203_v28 = vpop.f32.mrb[51].mxu1 }
 0x29b   :  { %v3078_v34 = vpack.c.bf16 %v2200_v55, %v2198_v23  ;;  %v2204_v56 = vadd.f32 %v2203_v28, %v4333_v33 }
 0x29d   :  { %2804 = vst [vmem:[#allocation9 + $0xc0] sm:$0xff] %v3078_v34  ;;  %v3079_v52 = vpack.c.bf16 %v2204_v56, %v2202_v48 }
 0x29f   :  { %2805 = vst [vmem:[#allocation9 + $0xc8] sm:$0xff] %v3079_v52  ;;  %v2207_v35 = vpop.f32.mrb[52].mxu1 }
 0x2a0   :  { %v2208_v12 = vadd.f32 %v2207_v35, %v4325_v29  ;;  %v2209_v27 = vpop.f32.mrb[53].mxu1 }
 0x2a1   :  { %v2210_v57 = vadd.f32 %v2209_v27, %v4333_v33  ;;  %v2211_v58 = vpop.f32.mrb[54].mxu1 }
 0x2a2   :  { %v2212_v26 = vadd.f32 %v2211_v58, %v4325_v29  ;;  %v2213_v17 = vpop.f32.mrb[55].mxu1 }
 0x2a3   :  { %v3080_v20 = vpack.c.bf16 %v2210_v57, %v2208_v12  ;;  %v2214_v37 = vadd.f32 %v2213_v17, %v4333_v33 }
 0x2a5   :  { %2806 = vst [vmem:[#allocation9 + $0xd0] sm:$0xff] %v3080_v20  ;;  %v3081_v19 = vpack.c.bf16 %v2214_v37, %v2212_v26 }
 0x2a7   :  { %2807 = vst [vmem:[#allocation9 + $0xd8] sm:$0xff] %v3081_v19  ;;  %v2217_v40 = vpop.f32.mrb[56].mxu1 }
 0x2a8   :  { %v2218_v24 = vadd.f32 %v2217_v40, %v4325_v29  ;;  %v2219_v25 = vpop.f32.mrb[57].mxu1 }
 0x2a9   :  { %v2220_v32 = vadd.f32 %v2219_v25, %v4333_v33  ;;  %v2221_v45 = vpop.f32.mrb[58].mxu1 }
 0x2aa   :  { %v2222_v49 = vadd.f32 %v2221_v45, %v4325_v29  ;;  %v2223_v53 = vpop.f32.mrb[59].mxu1 }
 0x2ab   :  { %v3082_v59 = vpack.c.bf16 %v2220_v32, %v2218_v24  ;;  %v2224_v7 = vadd.f32 %v2223_v53, %v4333_v33 }
 0x2ad   :  { %2808 = vst [vmem:[#allocation9 + $0xe0] sm:$0xff] %v3082_v59  ;;  %v3083_v63 = vpack.c.bf16 %v2224_v7, %v2222_v49 }
 0x2af   :  { %2809 = vst [vmem:[#allocation9 + $0xe8] sm:$0xff] %v3083_v63  ;;  %v2227_v9 = vpop.f32.mrb[60].mxu1 }
 0x2b0   :  { %v2228_v43 = vadd.f32 %v2227_v9, %v4325_v29  ;;  %v2229_v44 = vpop.f32.mrb[61].mxu1 }
 0x2b1   :  { %v2230_v11 = vadd.f32 %v2229_v44, %v4333_v33  ;;  %v2231_v38 = vpop.f32.mrb[62].mxu1 }
 0x2b2   :  { %v2232_v2 = vadd.f32 %v2231_v38, %v4325_v29  ;;  %v2233_v3 = vpop.f32.mrb[63].mxu1 }
 0x2b3   :  { %v3084_v21 = vpack.c.bf16 %v2230_v11, %v2228_v43  ;;  %v2234_v39 = vadd.f32 %v2233_v3, %v4333_v33 }
 0x2b5   :  { %2810 = vst [vmem:[#allocation9 + $0xf0] sm:$0xff] %v3084_v21  ;;  %v3085_v0 = vpack.c.bf16 %v2234_v39, %v2232_v2 }
 0x2b7   :  { %2811 = vst [vmem:[#allocation9 + $0xf8] sm:$0xff] %v3085_v0  ;;  %v2237_v4 = vpop.f32.mrb[64].mxu1 }
 0x2b8   :  { %v2238_v6 = vadd.f32 %v2237_v4, %v4325_v29  ;;  %v2239_v50 = vpop.f32.mrb[65].mxu1 }
 0x2b9   :  { %v2240_v62 = vadd.f32 %v2239_v50, %v4333_v33  ;;  %v2241_v54 = vpop.f32.mrb[66].mxu1 }
 0x2ba   :  { %v2242_v1 = vadd.f32 %v2241_v54, %v4325_v29  ;;  %v2243_v5 = vpop.f32.mrb[67].mxu1 }
 0x2bb   :  { %v3086_v46 = vpack.c.bf16 %v2240_v62, %v2238_v6  ;;  %v2244_v60 = vadd.f32 %v2243_v5, %v4333_v33 }
 0x2bd   :  { %2812 = vst [vmem:[#allocation9 + $0x100] sm:$0xff] %v3086_v46  ;;  %v3087_v42 = vpack.c.bf16 %v2244_v60, %v2242_v1 }
 0x2bf   :  { %2813 = vst [vmem:[#allocation9 + $0x108] sm:$0xff] %v3087_v42  ;;  %v2247_v61 = vpop.f32.mrb[68].mxu1 }
 0x2c0   :  { %v2248_v15 = vadd.f32 %v2247_v61, %v4325_v29  ;;  %v2249_v51 = vpop.f32.mrb[69].mxu1 }
 0x2c1   :  { %v2250_v16 = vadd.f32 %v2249_v51, %v4333_v33  ;;  %v2251_v8 = vpop.f32.mrb[70].mxu1 }
 0x2c2   :  { %v2252_v10 = vadd.f32 %v2251_v8, %v4325_v29  ;;  %v2253_v14 = vpop.f32.mrb[71].mxu1 }
 0x2c3   :  { %v3088_v18 = vpack.c.bf16 %v2250_v16, %v2248_v15  ;;  %v2254_v22 = vadd.f32 %v2253_v14, %v4333_v33 }
 0x2c5   :  { %2814 = vst [vmem:[#allocation9 + $0x110] sm:$0xff] %v3088_v18  ;;  %v3089_v13 = vpack.c.bf16 %v2254_v22, %v2252_v10 }
 0x2c7   :  { %2815 = vst [vmem:[#allocation9 + $0x118] sm:$0xff] %v3089_v13  ;;  %v2257_v36 = vpop.f32.mrb[72].mxu1 }
 0x2c8   :  { %v2258_v47 = vadd.f32 %v2257_v36, %v4325_v29  ;;  %v2259_v41 = vpop.f32.mrb[73].mxu1 }
 0x2c9   :  { %v2260_v23 = vadd.f32 %v2259_v41, %v4333_v33  ;;  %v2261_v31 = vpop.f32.mrb[74].mxu1 }
 0x2ca   :  { %v2262_v55 = vadd.f32 %v2261_v31, %v4325_v29  ;;  %v2263_v30 = vpop.f32.mrb[75].mxu1 }
 0x2cb   :  { %v3090_v48 = vpack.c.bf16 %v2260_v23, %v2258_v47  ;;  %v2264_v28 = vadd.f32 %v2263_v30, %v4333_v33 }
 0x2cd   :  { %2816 = vst [vmem:[#allocation9 + $0x120] sm:$0xff] %v3090_v48  ;;  %v3091_v34 = vpack.c.bf16 %v2264_v28, %v2262_v55 }
 0x2cf   :  { %2817 = vst [vmem:[#allocation9 + $0x128] sm:$0xff] %v3091_v34  ;;  %v2267_v56 = vpop.f32.mrb[76].mxu1 }
 0x2d0   :  { %v2268_v52 = vadd.f32 %v2267_v56, %v4325_v29  ;;  %v2269_v35 = vpop.f32.mrb[77].mxu1 }
 0x2d1   :  { %v2270_v12 = vadd.f32 %v2269_v35, %v4333_v33  ;;  %v2271_v27 = vpop.f32.mrb[78].mxu1 }
 0x2d2   :  { %v2272_v57 = vadd.f32 %v2271_v27, %v4325_v29  ;;  %v2273_v58 = vpop.f32.mrb[79].mxu1 }
 0x2d3   :  { %v3092_v26 = vpack.c.bf16 %v2270_v12, %v2268_v52  ;;  %v2274_v17 = vadd.f32 %v2273_v58, %v4333_v33 }
 0x2d5   :  { %2818 = vst [vmem:[#allocation9 + $0x130] sm:$0xff] %v3092_v26  ;;  %v3093_v20 = vpack.c.bf16 %v2274_v17, %v2272_v57 }
 0x2d7   :  { %2819 = vst [vmem:[#allocation9 + $0x138] sm:$0xff] %v3093_v20  ;;  %v2277_v37 = vpop.f32.mrb[80].mxu1 }
 0x2d8   :  { %v2278_v19 = vadd.f32 %v2277_v37, %v4325_v29  ;;  %v2279_v40 = vpop.f32.mrb[81].mxu1 }
 0x2d9   :  { %v2280_v24 = vadd.f32 %v2279_v40, %v4333_v33  ;;  %v2281_v25 = vpop.f32.mrb[82].mxu1 }
 0x2da   :  { %v2282_v32 = vadd.f32 %v2281_v25, %v4325_v29  ;;  %v2283_v45 = vpop.f32.mrb[83].mxu1 }
 0x2db   :  { %v3094_v49 = vpack.c.bf16 %v2280_v24, %v2278_v19  ;;  %v2284_v53 = vadd.f32 %v2283_v45, %v4333_v33 }
 0x2dd   :  { %2820 = vst [vmem:[#allocation9 + $0x140] sm:$0xff] %v3094_v49  ;;  %v3095_v59 = vpack.c.bf16 %v2284_v53, %v2282_v32 }
 0x2df   :  { %2821 = vst [vmem:[#allocation9 + $0x148] sm:$0xff] %v3095_v59  ;;  %v2287_v7 = vpop.f32.mrb[84].mxu1 }
 0x2e0   :  { %v2288_v63 = vadd.f32 %v2287_v7, %v4325_v29  ;;  %v2289_v9 = vpop.f32.mrb[85].mxu1 }
 0x2e1   :  { %v2290_v43 = vadd.f32 %v2289_v9, %v4333_v33  ;;  %v2291_v44 = vpop.f32.mrb[86].mxu1 }
 0x2e2   :  { %v2292_v11 = vadd.f32 %v2291_v44, %v4325_v29  ;;  %v2293_v38 = vpop.f32.mrb[87].mxu1 }
 0x2e3   :  { %v3096_v2 = vpack.c.bf16 %v2290_v43, %v2288_v63  ;;  %v2294_v3 = vadd.f32 %v2293_v38, %v4333_v33 }
 0x2e5   :  { %2822 = vst [vmem:[#allocation9 + $0x150] sm:$0xff] %v3096_v2  ;;  %v3097_v21 = vpack.c.bf16 %v2294_v3, %v2292_v11 }
 0x2e7   :  { %2823 = vst [vmem:[#allocation9 + $0x158] sm:$0xff] %v3097_v21  ;;  %v2297_v39 = vpop.f32.mrb[88].mxu1 }
 0x2e8   :  { %v2298_v0 = vadd.f32 %v2297_v39, %v4325_v29  ;;  %v2299_v4 = vpop.f32.mrb[89].mxu1 }
 0x2e9   :  { %v2300_v6 = vadd.f32 %v2299_v4, %v4333_v33  ;;  %v2301_v50 = vpop.f32.mrb[90].mxu1 }
 0x2ea   :  { %v2302_v62 = vadd.f32 %v2301_v50, %v4325_v29  ;;  %v2303_v54 = vpop.f32.mrb[91].mxu1 }
 0x2eb   :  { %v3098_v1 = vpack.c.bf16 %v2300_v6, %v2298_v0  ;;  %v2304_v5 = vadd.f32 %v2303_v54, %v4333_v33 }
 0x2ed   :  { %2824 = vst [vmem:[#allocation9 + $0x160] sm:$0xff] %v3098_v1  ;;  %v3099_v46 = vpack.c.bf16 %v2304_v5, %v2302_v62 }
 0x2ef   :  { %2825 = vst [vmem:[#allocation9 + $0x168] sm:$0xff] %v3099_v46  ;;  %v2307_v60 = vpop.f32.mrb[92].mxu1 }
 0x2f0   :  { %v2308_v42 = vadd.f32 %v2307_v60, %v4325_v29  ;;  %v2309_v61 = vpop.f32.mrb[93].mxu1 }
 0x2f1   :  { %v2310_v15 = vadd.f32 %v2309_v61, %v4333_v33  ;;  %v2311_v51 = vpop.f32.mrb[94].mxu1 }
 0x2f2   :  { %v2312_v16 = vadd.f32 %v2311_v51, %v4325_v29  ;;  %v2313_v8 = vpop.f32.mrb[95].mxu1 }
 0x2f3   :  { %v3100_v10 = vpack.c.bf16 %v2310_v15, %v2308_v42  ;;  %v2314_v14 = vadd.f32 %v2313_v8, %v4333_v33 }
 0x2f5   :  { %2826 = vst [vmem:[#allocation9 + $0x170] sm:$0xff] %v3100_v10  ;;  %v3101_v18 = vpack.c.bf16 %v2314_v14, %v2312_v16 }
 0x2f7   :  { %2827 = vst [vmem:[#allocation9 + $0x178] sm:$0xff] %v3101_v18  ;;  %v2317_v22 = vpop.f32.mrb[96].mxu1 }
 0x2f8   :  { %v2318_v13 = vadd.f32 %v2317_v22, %v4325_v29  ;;  %v2319_v36 = vpop.f32.mrb[97].mxu1 }
 0x2f9   :  { %v2320_v47 = vadd.f32 %v2319_v36, %v4333_v33  ;;  %v2321_v41 = vpop.f32.mrb[98].mxu1 }
 0x2fa   :  { %v2322_v23 = vadd.f32 %v2321_v41, %v4325_v29  ;;  %v2323_v31 = vpop.f32.mrb[99].mxu1 }
 0x2fb   :  { %v3102_v55 = vpack.c.bf16 %v2320_v47, %v2318_v13  ;;  %v2324_v30 = vadd.f32 %v2323_v31, %v4333_v33 }
 0x2fd   :  { %2828 = vst [vmem:[#allocation9 + $0x180] sm:$0xff] %v3102_v55  ;;  %v3103_v48 = vpack.c.bf16 %v2324_v30, %v2322_v23 }
 0x2ff   :  { %2829 = vst [vmem:[#allocation9 + $0x188] sm:$0xff] %v3103_v48  ;;  %v2327_v28 = vpop.f32.mrb[100].mxu1 }
 0x300   :  { %v2328_v34 = vadd.f32 %v2327_v28, %v4325_v29  ;;  %v2329_v56 = vpop.f32.mrb[101].mxu1 }
 0x301   :  { %v2330_v52 = vadd.f32 %v2329_v56, %v4333_v33  ;;  %v2331_v35 = vpop.f32.mrb[102].mxu1 }
 0x302   :  { %v2332_v12 = vadd.f32 %v2331_v35, %v4325_v29  ;;  %v2333_v27 = vpop.f32.mrb[103].mxu1 }
 0x303   :  { %v3104_v57 = vpack.c.bf16 %v2330_v52, %v2328_v34  ;;  %v2334_v58 = vadd.f32 %v2333_v27, %v4333_v33 }
 0x305   :  { %2830 = vst [vmem:[#allocation9 + $0x190] sm:$0xff] %v3104_v57  ;;  %v3105_v26 = vpack.c.bf16 %v2334_v58, %v2332_v12 }
 0x307   :  { %2831 = vst [vmem:[#allocation9 + $0x198] sm:$0xff] %v3105_v26  ;;  %v2337_v17 = vpop.f32.mrb[104].mxu1 }
 0x308   :  { %v2338_v20 = vadd.f32 %v2337_v17, %v4325_v29  ;;  %v2339_v37 = vpop.f32.mrb[105].mxu1 }
 0x309   :  { %v2340_v19 = vadd.f32 %v2339_v37, %v4333_v33  ;;  %v2341_v40 = vpop.f32.mrb[106].mxu1 }
 0x30a   :  { %v2342_v24 = vadd.f32 %v2341_v40, %v4325_v29  ;;  %v2343_v25 = vpop.f32.mrb[107].mxu1 }
 0x30b   :  { %v3106_v32 = vpack.c.bf16 %v2340_v19, %v2338_v20  ;;  %v2344_v45 = vadd.f32 %v2343_v25, %v4333_v33 }
 0x30d   :  { %2832 = vst [vmem:[#allocation9 + $0x1a0] sm:$0xff] %v3106_v32  ;;  %v3107_v49 = vpack.c.bf16 %v2344_v45, %v2342_v24 }
 0x30f   :  { %2833 = vst [vmem:[#allocation9 + $0x1a8] sm:$0xff] %v3107_v49  ;;  %v2347_v53 = vpop.f32.mrb[108].mxu1 }
 0x310   :  { %v2348_v59 = vadd.f32 %v2347_v53, %v4325_v29  ;;  %v2349_v7 = vpop.f32.mrb[109].mxu1 }
 0x311   :  { %v2350_v63 = vadd.f32 %v2349_v7, %v4333_v33  ;;  %v2351_v9 = vpop.f32.mrb[110].mxu1 }
 0x312   :  { %v2352_v43 = vadd.f32 %v2351_v9, %v4325_v29  ;;  %v2353_v44 = vpop.f32.mrb[111].mxu1 }
 0x313   :  { %v3108_v11 = vpack.c.bf16 %v2350_v63, %v2348_v59  ;;  %v2354_v38 = vadd.f32 %v2353_v44, %v4333_v33 }
 0x315   :  { %2834 = vst [vmem:[#allocation9 + $0x1b0] sm:$0xff] %v3108_v11  ;;  %v3109_v2 = vpack.c.bf16 %v2354_v38, %v2352_v43 }
 0x317   :  { %2835 = vst [vmem:[#allocation9 + $0x1b8] sm:$0xff] %v3109_v2 }
 0x318   :  { %v2357_v3 = vpop.f32.mrb[112].mxu1 }
 0x319   :  { %v2358_v21 = vadd.f32 %v2357_v3, %v4325_v29  ;;  %v2359_v39 = vpop.f32.mrb[113].mxu1 }
 0x31a   :  { %v2360_v0 = vadd.f32 %v2359_v39, %v4333_v33  ;;  %v2361_v4 = vpop.f32.mrb[114].mxu1 }
 0x31b   :  { %v2362_v6 = vadd.f32 %v2361_v4, %v4325_v29  ;;  %v2363_v50 = vpop.f32.mrb[115].mxu1 }
 0x31c   :  { %v3110_v62 = vpack.c.bf16 %v2360_v0, %v2358_v21  ;;  %v2364_v54 = vadd.f32 %v2363_v50, %v4333_v33 }
 0x31e   :  { %2836 = vst [vmem:[#allocation9 + $0x1c0] sm:$0xff] %v3110_v62  ;;  %v3111_v1 = vpack.c.bf16 %v2364_v54, %v2362_v6 }
 0x320   :  { %2837 = vst [vmem:[#allocation9 + $0x1c8] sm:$0xff] %v3111_v1  ;;  %v2367_v5 = vpop.f32.mrb[116].mxu1 }
 0x321   :  { %v2368_v46 = vadd.f32 %v2367_v5, %v4325_v29  ;;  %v2369_v60 = vpop.f32.mrb[117].mxu1 }
 0x322   :  { %v2370_v42 = vadd.f32 %v2369_v60, %v4333_v33  ;;  %v2371_v61 = vpop.f32.mrb[118].mxu1 }
 0x323   :  { %v2372_v15 = vadd.f32 %v2371_v61, %v4325_v29  ;;  %v2373_v51 = vpop.f32.mrb[119].mxu1 }
 0x324   :  { %v3112_v16 = vpack.c.bf16 %v2370_v42, %v2368_v46  ;;  %v2374_v8 = vadd.f32 %v2373_v51, %v4333_v33 }
 0x326   :  { %2838 = vst [vmem:[#allocation9 + $0x1d0] sm:$0xff] %v3112_v16  ;;  %v3113_v10 = vpack.c.bf16 %v2374_v8, %v2372_v15 }
 0x328   :  { %2839 = vst [vmem:[#allocation9 + $0x1d8] sm:$0xff] %v3113_v10  ;;  %v2377_v14 = vpop.f32.mrb[120].mxu1 }
 0x329   :  { %v2378_v18 = vadd.f32 %v2377_v14, %v4325_v29  ;;  %v2379_v22 = vpop.f32.mrb[121].mxu1 }
 0x32a   :  { %v2380_v13 = vadd.f32 %v2379_v22, %v4333_v33  ;;  %v2381_v36 = vpop.f32.mrb[122].mxu1 }
 0x32b   :  { %v2382_v47 = vadd.f32 %v2381_v36, %v4325_v29  ;;  %v2383_v41 = vpop.f32.mrb[123].mxu1 }
 0x32c   :  { %v3114_v23 = vpack.c.bf16 %v2380_v13, %v2378_v18  ;;  %v2384_v31 = vadd.f32 %v2383_v41, %v4333_v33 }
 0x32e   :  { %2840 = vst [vmem:[#allocation9 + $0x1e0] sm:$0xff] %v3114_v23  ;;  %v3115_v55 = vpack.c.bf16 %v2384_v31, %v2382_v47 }
 0x330   :  { %2841 = vst [vmem:[#allocation9 + $0x1e8] sm:$0xff] %v3115_v55  ;;  %v2387_v30 = vpop.f32.mrb[124].mxu1 }
 0x331   :  { %v2388_v48 = vadd.f32 %v2387_v30, %v4325_v29  ;;  %v2389_v28 = vpop.f32.mrb[125].mxu1 }
 0x332   :  { %v2390_v34 = vadd.f32 %v2389_v28, %v4333_v33  ;;  %v2391_v56 = vpop.f32.mrb[126].mxu1 }
 0x333   :  { %v2392_v52 = vadd.f32 %v2391_v56, %v4325_v29  ;;  %v2393_v35 = vpop.f32.mrb[127].mxu1 }
 0x334   :  { %v3116_v12 = vpack.c.bf16 %v2390_v34, %v2388_v48  ;;  %v2394_v27 = vadd.f32 %v2393_v35, %v4333_v33 }
 0x336   :  { %2842 = vst [vmem:[#allocation9 + $0x1f0] sm:$0xff] %v3116_v12  ;;  %v3117_v57 = vpack.c.bf16 %v2394_v27, %v2392_v52 }
 0x338   :  { %2843 = vst [vmem:[#allocation9 + $0x1f8] sm:$0xff] %v3117_v57 }
 0x339   :  { %3649 = shalt.err (!%p3646_p0)
}
 0x33a   :  { %s3650_s12 = scalar_lea.hbm %s4544_s5, 8192 }
 0x33b   :  { %p3651_p1 = scmp.ne.s32.totalorder %s4544_s5, %s3650_s12  ;;  %p3654_p2 = scmp.lt.u32.totalorder %s3650_s12, %s4544_s5 }
 0x33d   :  { %p3656_p3 = pnand %p3654_p2, %p3651_p1 }
 0x33f   :  { %3659 = shalt.err (!%p3656_p3)
}
 0x340   :  { %2855 = dma.vmem_to_hbm [thread:$0]  %s2850_s8, 8192, %s4544_s5, [#allocation5], %s3668_s30, %s3668_s30, %s3669_s6  }
 0x341   :  { %3664 = dma.done.wait [#allocation5], 8192  }
 0x342   :  { %3665 = vsyncadd [#allocation5], 4294959104 }
 0x343   :  { %2859 = vsyncpa [#allocation4], 1 }
 0x344   :  { %2860 = vsyncpa [#allocation7], 1 }
 0x345   :  { %2861 = vsyncpa [#allocation5], 1 }

</bundles_post_ra>
